<compile_context>
chip_gen: v7x
topology: tpu7x:2x2x1
jax: 0.10.0
libtpu: 0.0.40
codegen_flags: <defaults>
</compile_context>

<pallas_src>
import functools

import jax
import jax.numpy as jnp
from jax import lax
from jax.experimental import pallas as pl
from jax.experimental.pallas import tpu as pltpu

_NEG_BIG = -1e30


def _round_up(x, m):
    return ((x + m - 1) // m) * m


def _vmem_limit_bytes(tq, tk, D):
    bf = 2            # bf16 itemsize for streamed projections / key slab / q scratch
    dbuf = 2          # Pallas double-buffers each streamed operand
    streamed = dbuf * (tq * D * bf      # resident query tile
                       + D * tk * bf    # streamed (pre-transposed) key tile
                       + tq * 4 + tk * 4   # label blocks
                       + tq * 4)           # per-row output block
    scratch = 4 * tq * 4 + tq * D * bf     # m, l, s, d accumulators + scaled-q cache
    temps = 6 * tq * tk * 4                # a few live (tq, tk) f32 intermediates
    est = int(1.5 * (streamed + scratch + temps))
    return max(16 << 20, min(est, 32 << 20))


def _supcon_kernel(q_ref, kt_ref, labq_ref, labk_ref, o_ref,
                   m_ref, l_ref, s_ref, d_ref, qs_ref,
                   *, inv_temperature, n_valid, pad_b, compute_dtype):
    kv = pl.program_id(1)
    tq = q_ref.shape[0]
    tk = kt_ref.shape[1]

    @pl.when(kv == 0)
    def _init():
        m_ref[...] = jnp.full_like(m_ref, _NEG_BIG)
        l_ref[...] = jnp.zeros_like(l_ref)
        s_ref[...] = jnp.zeros_like(s_ref)
        d_ref[...] = jnp.zeros_like(d_ref)
        # Fold 1/T into the resident query tile once per row tile (cached in VMEM scratch).
        qs_ref[...] = (q_ref[...].astype(jnp.float32) * inv_temperature).astype(compute_dtype)

    # Natural (tq, D) x (D, tk) MXU product, bf16 operands, f32 accumulation.
    sim = jnp.dot(qs_ref[...], kt_ref[...], preferred_element_type=jnp.float32)  # (tq, tk)

    # Positive-pair accumulation. Padded key labels are a sentinel that never matches a
    # real label, so no valid-column mask is needed here. Diagonal is included (as in ref).
    pos = labq_ref[...] == labk_ref[...]                       # (tq,1) == (1,tk) -> (tq,tk)
    s_ref[...] += jnp.sum(jnp.where(pos, sim, 0.0), axis=1, keepdims=True)
    d_ref[...] += jnp.sum(jnp.where(pos, 1.0, 0.0), axis=1, keepdims=True)

    row0 = pl.program_id(0) * tq
    col0 = kv * tk
    m_prev = m_ref[...]                                        # (tq, 1)

    diag_hit = jnp.logical_and(row0 < col0 + tk, col0 < row0 + tq)
    if pad_b > 0:
        special = jnp.logical_or(diag_hit, col0 + tk > n_valid)
    else:
        special = diag_hit

    # --- fast path: tile touches neither the diagonal nor padded columns ---
    @pl.when(jnp.logical_not(special))
    def _plain():
        tile_max = jnp.max(sim, axis=1, keepdims=True)
        m_new = jnp.maximum(m_prev, tile_max)
        p_sum = jnp.sum(jnp.exp(sim - m_new), axis=1, keepdims=True)
        l_ref[...] = jnp.exp(m_prev - m_new) * l_ref[...] + p_sum
        m_ref[...] = m_new

    # --- masked path: diagonal and/or padded key columns present in this tile ---
    @pl.when(special)
    def _masked():
        rows = row0 + lax.broadcasted_iota(jnp.int32, (tq, 1), 0)
        cols = col0 + lax.broadcasted_iota(jnp.int32, (1, tk), 1)
        keep = rows != cols                                    # broadcast -> (tq, tk)
        if pad_b > 0:
            keep = jnp.logical_and(keep, cols < n_valid)
        sim_m = jnp.where(keep, sim, _NEG_BIG)                 # fused mask, exp-safe
        tile_max = jnp.max(sim_m, axis=1, keepdims=True)
        m_new = jnp.maximum(m_prev, tile_max)
        p_sum = jnp.sum(jnp.exp(sim_m - m_new), axis=1, keepdims=True)
        l_ref[...] = jnp.exp(m_prev - m_new) * l_ref[...] + p_sum
        m_ref[...] = m_new

    @pl.when(kv == pl.num_programs(1) - 1)
    def _finalize():
        d = d_ref[...]
        # sum_j mask * (sim - logZ) = sum(mask*sim) - d*m - d*log(l)
        num = s_ref[...] - d * m_ref[...] - d * jnp.log(l_ref[...])
        o_ref[...] = num / jnp.maximum(d, 1.0)    # padded rows are sliced off in wrapper


def supervised_contrastive_loss(projections, labels, temperature=0.07,
                                compute_dtype=jnp.bfloat16):
    """projections: [B, D] float, labels: [B] int -> scalar float32 loss."""
    B, D = projections.shape

    # Tile sizing: always >= 2 row tiles (v7x megacore), tk=512 for large batches.
    if B <= 256:
        Bp, tq, tk = 256, 128, 256
    else:
        Bp = _round_up(B, 512)
        tq, tk = 256, 512
    pad_b = Bp - B

    # Projections live in HBM as bf16 (halves key-stream DMA bytes, esp. on v5e).
    p_c = projections.astype(compute_dtype)
    if pad_b:
        p_c = jnp.pad(p_c, ((0, pad_b), (0, 0)))
    kt_c = p_c.T                                  # (D, Bp) pre-transposed key slab

    lab = labels.reshape(-1).astype(jnp.int32)
    if pad_b:
        sentinel = jnp.min(lab) - 1               # cannot collide with any real label
        lab = jnp.concatenate([lab, jnp.broadcast_to(sentinel, (pad_b,))])
    lab_col = lab.reshape(Bp, 1)                  # query-side labels
    lab_row = lab.reshape(1, Bp)                  # key-side labels (lane-dense row)

    kernel = functools.partial(
        _supcon_kernel,
        inv_temperature=float(1.0 / temperature),
        n_valid=B,
        pad_b=pad_b,
        compute_dtype=compute_dtype,
    )

    per_row = pl.pallas_call(
        kernel,
        out_shape=jax.ShapeDtypeStruct((Bp, 1), jnp.float32),
        grid_spec=pltpu.PrefetchScalarGridSpec(
            num_scalar_prefetch=0,
            grid=(Bp // tq, Bp // tk),                       # (row tiles, key tiles)
            in_specs=[
                pl.BlockSpec((tq, D), lambda i, j: (i, 0)),  # resident query tile (bf16)
                pl.BlockSpec((D, tk), lambda i, j: (0, j)),  # streamed key tile (bf16, D x tk)
                pl.BlockSpec((tq, 1), lambda i, j: (i, 0)),  # query labels
                pl.BlockSpec((1, tk), lambda i, j: (0, j)),  # key labels
            ],
            out_specs=pl.BlockSpec((tq, 1), lambda i, j: (i, 0)),
            scratch_shapes=[pltpu.VMEM((tq, 1), jnp.float32)] * 4      # m, l, s, d
                          + [pltpu.VMEM((tq, D), compute_dtype)],       # scaled-q cache
        ),
        compiler_params=pltpu.CompilerParams(
            dimension_semantics=("parallel", "arbitrary"),
            vmem_limit_bytes=_vmem_limit_bytes(tq, tk, D),
        ),
    )(p_c, kt_c, lab_col, lab_row)

    mean_log_prob_pos = per_row[:B, 0]
    return -jnp.mean(mean_log_prob_pos)


def _reference_supcon(projections, labels, temperature=0.07, compute_dtype=None):
    """Pure-JAX reference mirroring the PyTorch module.

    With compute_dtype set, the similarity matmul mimics the kernel's bf16 MXU path
    (projections rounded to bf16, 1/T folded into the bf16 query operand, f32 accum).
    """
    p = projections.astype(jnp.float32)
    B = p.shape[0]
    if compute_dtype is not None:
        pc = p.astype(compute_dtype)
        q = (pc.astype(jnp.float32) * (1.0 / temperature)).astype(compute_dtype).astype(jnp.float32)
        k = pc.astype(jnp.float32)
        sim = q @ k.T
    else:
        sim = (p @ p.T) / temperature
    lab = labels.reshape(-1, 1)
    mask = (lab == lab.T).astype(jnp.float32)
    logits = sim - jnp.max(sim, axis=1, keepdims=True)
    exp_logits = jnp.exp(logits) * (1.0 - jnp.eye(B, dtype=jnp.float32))
    log_prob = logits - jnp.log(jnp.sum(exp_logits, axis=1, keepdims=True))
    mean_log_prob_pos = jnp.sum(mask * log_prob, axis=1) / jnp.sum(mask, axis=1)
    return -jnp.mean(mean_log_prob_pos)


if __name__ == "__main__":
    key = jax.random.PRNGKey(0)
    kp, kl = jax.random.split(key)

    B, D = 8, 32
    projections = jax.random.normal(kp, (B, D), dtype=jnp.float32)
    # L2-normalize like a typical projection head output.
    projections = projections / jnp.linalg.norm(projections, axis=1, keepdims=True)
    labels = jax.random.randint(kl, (B,), 0, 3, dtype=jnp.int32)

    loss = supervised_contrastive_loss(projections, labels, temperature=0.07)
    loss = jax.block_until_ready(loss)

    ref_f32 = _reference_supcon(projections, labels, temperature=0.07)
    ref_bf16 = _reference_supcon(projections, labels, temperature=0.07,
                                 compute_dtype=jnp.bfloat16)

    assert bool(jnp.isfinite(loss)), loss
    # Tight check against a reference that mirrors the kernel's bf16 MXU precision.
    assert jnp.allclose(loss, ref_bf16, rtol=1e-3, atol=1e-3), (loss, ref_bf16)
    # Loose check against the exact f32 PyTorch-equivalent reference (bf16 matmul error).
    assert jnp.allclose(loss, ref_f32, rtol=2e-2, atol=2e-2), (loss, ref_f32)

    print("KERNEL_OK")
</pallas_src>

<mosaic_0001>
module attributes {stable_mosaic.version = 11 : i64} {
  func.func @_supcon_kernel(%arg0: i32, %arg1: i32, %arg2: memref<128x32xbf16, #tpu.memory_space<vmem>>, %arg3: memref<32x256xbf16, #tpu.memory_space<vmem>>, %arg4: memref<128x1xi32, #tpu.memory_space<vmem>>, %arg5: memref<1x256xi32, #tpu.memory_space<vmem>>, %arg6: memref<128x1xf32, #tpu.memory_space<vmem>>, %arg7: memref<128x1xf32, #tpu.memory_space<vmem>>, %arg8: memref<128x1xf32, #tpu.memory_space<vmem>>, %arg9: memref<128x1xf32, #tpu.memory_space<vmem>>, %arg10: memref<128x1xf32, #tpu.memory_space<vmem>>, %arg11: memref<128x32xbf16, #tpu.memory_space<vmem>>) attributes {dimension_semantics = [#tpu.dimension_semantics<parallel>, #tpu.dimension_semantics<arbitrary>], iteration_bounds = array<i64: 2, 1>, scalar_prefetch = 0 : i64, scratch_operands = 5 : i64, tpu.core_type = #tpu.core_type<tc>, window_params = [{transform_indices = @transform_0, window_bounds = array<i64: 128, 32>}, {transform_indices = @transform_1, window_bounds = array<i64: 32, 256>}, {transform_indices = @transform_2, window_bounds = array<i64: 128, 1>}, {transform_indices = @transform_3, window_bounds = array<i64: 1, 256>}, {transform_indices = @transform_4, window_bounds = array<i64: 128, 1>}]} {
    %c0_i32 = arith.constant 0 : i32
    %0 = arith.cmpi eq, %arg1, %c0_i32 : i32
    %1 = arith.extui %0 : i1 to i32
    %c0_i32_0 = arith.constant 0 : i32
    %2 = arith.cmpi ne, %1, %c0_i32_0 : i32
    scf.if %2 {
      %cst_30 = arith.constant -1.000000e+30 : f32
      %45 = vector.broadcast %cst_30 : f32 to vector<128x1xf32>
      %c0_31 = arith.constant 0 : index
      %c0_32 = arith.constant 0 : index
      %46 = vector.load %arg7[%c0_31, %c0_32] : memref<128x1xf32, #tpu.memory_space<vmem>>, vector<128x1xf32>
      tpu.vector_store %arg7[%c0_31, %c0_32], %45 {strides = array<i32>} : memref<128x1xf32, #tpu.memory_space<vmem>>, vector<128x1xf32>,
      %cst_33 = arith.constant 0.000000e+00 : f32
      %47 = vector.broadcast %cst_33 : f32 to vector<128x1xf32>
      %c0_34 = arith.constant 0 : index
      %c0_35 = arith.constant 0 : index
      %48 = vector.load %arg8[%c0_34, %c0_35] : memref<128x1xf32, #tpu.memory_space<vmem>>, vector<128x1xf32>
      tpu.vector_store %arg8[%c0_34, %c0_35], %47 {strides = array<i32>} : memref<128x1xf32, #tpu.memory_space<vmem>>, vector<128x1xf32>,
      %cst_36 = arith.constant 0.000000e+00 : f32
      %49 = vector.broadcast %cst_36 : f32 to vector<128x1xf32>
      %c0_37 = arith.constant 0 : index
      %c0_38 = arith.constant 0 : index
      %50 = vector.load %arg9[%c0_37, %c0_38] : memref<128x1xf32, #tpu.memory_space<vmem>>, vector<128x1xf32>
      tpu.vector_store %arg9[%c0_37, %c0_38], %49 {strides = array<i32>} : memref<128x1xf32, #tpu.memory_space<vmem>>, vector<128x1xf32>,
      %cst_39 = arith.constant 0.000000e+00 : f32
      %51 = vector.broadcast %cst_39 : f32 to vector<128x1xf32>
      %c0_40 = arith.constant 0 : index
      %c0_41 = arith.constant 0 : index
      %52 = vector.load %arg10[%c0_40, %c0_41] : memref<128x1xf32, #tpu.memory_space<vmem>>, vector<128x1xf32>
      tpu.vector_store %arg10[%c0_40, %c0_41], %51 {strides = array<i32>} : memref<128x1xf32, #tpu.memory_space<vmem>>, vector<128x1xf32>,
      %c0_42 = arith.constant 0 : index
      %c0_43 = arith.constant 0 : index
      %53 = vector.load %arg2[%c0_42, %c0_43] : memref<128x32xbf16, #tpu.memory_space<vmem>>, vector<128x32xbf16>
      %54 = arith.extf %53 : vector<128x32xbf16> to vector<128x32xf32>
      %cst_44 = arith.constant 14.2857141 : f32
      %55 = vector.broadcast %cst_44 : f32 to vector<128x32xf32>
      %56 = arith.mulf %54, %55 : vector<128x32xf32>
      %57 = arith.truncf %56 : vector<128x32xf32> to vector<128x32xbf16>
      %c0_45 = arith.constant 0 : index
      %c0_46 = arith.constant 0 : index
      %58 = vector.load %arg11[%c0_45, %c0_46] : memref<128x32xbf16, #tpu.memory_space<vmem>>, vector<128x32xbf16>
      tpu.vector_store %arg11[%c0_45, %c0_46], %57 {strides = array<i32>} : memref<128x32xbf16, #tpu.memory_space<vmem>>, vector<128x32xbf16>,
    } else {
    }
    %c0 = arith.constant 0 : index
    %c0_1 = arith.constant 0 : index
    %3 = vector.load %arg11[%c0, %c0_1] : memref<128x32xbf16, #tpu.memory_space<vmem>>, vector<128x32xbf16>
    %c0_2 = arith.constant 0 : index
    %c0_3 = arith.constant 0 : index
    %4 = vector.load %arg3[%c0_2, %c0_3] : memref<32x256xbf16, #tpu.memory_space<vmem>>, vector<32x256xbf16>
    %cst = arith.constant dense<0.000000e+00> : vector<128x256xf32>
    %5 = tpu.matmul %3, %4, %cst {dimension_numbers = #tpu.dot_dimension_numbers<[1], [0], [0], [1], [0, 0, 1, 1], [], []>} : vector<128x32xbf16>, vector<32x256xbf16>, vector<128x256xf32> -> vector<128x256xf32>
    %c0_4 = arith.constant 0 : index
    %c0_5 = arith.constant 0 : index
    %6 = vector.load %arg4[%c0_4, %c0_5] : memref<128x1xi32, #tpu.memory_space<vmem>>, vector<128x1xi32>
    %c0_6 = arith.constant 0 : index
    %c0_7 = arith.constant 0 : index
    %7 = vector.load %arg5[%c0_6, %c0_7] : memref<1x256xi32, #tpu.memory_space<vmem>>, vector<1x256xi32>
    %8 = vector.broadcast %6 : vector<128x1xi32> to vector<128x256xi32>
    %9 = vector.broadcast %7 : vector<1x256xi32> to vector<128x256xi32>
    %10 = arith.cmpi eq, %8, %9 : vector<128x256xi32>
    %c0_8 = arith.constant 0 : index
    %c0_9 = arith.constant 0 : index
    %11 = vector.load %arg9[%c0_8, %c0_9] : memref<128x1xf32, #tpu.memory_space<vmem>>, vector<128x1xf32>
    %cst_10 = arith.constant 0.000000e+00 : f32
    %12 = vector.broadcast %cst_10 : f32 to vector<128x256xf32>
    %13 = arith.select %10, %5, %12 : vector<128x256xi1>, vector<128x256xf32>
    %cst_11 = arith.constant dense<0.000000e+00> : vector<128xf32>
    %14 = vector.multi_reduction <add>, %13, %cst_11 [1] : vector<128x256xf32> to vector<128xf32>
    %15 = vector.shape_cast %14 : vector<128xf32> to vector<128x1xf32>
    %16 = arith.addf %11, %15 : vector<128x1xf32>
    %c0_12 = arith.constant 0 : index
    %c0_13 = arith.constant 0 : index
    %17 = vector.load %arg9[%c0_12, %c0_13] : memref<128x1xf32, #tpu.memory_space<vmem>>, vector<128x1xf32>
    tpu.vector_store %arg9[%c0_12, %c0_13], %16 {strides = array<i32>} : memref<128x1xf32, #tpu.memory_space<vmem>>, vector<128x1xf32>,
    %c0_14 = arith.constant 0 : index
    %c0_15 = arith.constant 0 : index
    %18 = vector.load %arg10[%c0_14, %c0_15] : memref<128x1xf32, #tpu.memory_space<vmem>>, vector<128x1xf32>
    %cst_16 = arith.constant 1.000000e+00 : f32
    %cst_17 = arith.constant 0.000000e+00 : f32
    %19 = vector.broadcast %cst_16 : f32 to vector<128x256xf32>
    %20 = vector.broadcast %cst_17 : f32 to vector<128x256xf32>
    %21 = arith.select %10, %19, %20 : vector<128x256xi1>, vector<128x256xf32>
    %cst_18 = arith.constant dense<0.000000e+00> : vector<128xf32>
    %22 = vector.multi_reduction <add>, %21, %cst_18 [1] : vector<128x256xf32> to vector<128xf32>
    %23 = vector.shape_cast %22 : vector<128xf32> to vector<128x1xf32>
    %24 = arith.addf %18, %23 : vector<128x1xf32>
    %c0_19 = arith.constant 0 : index
    %c0_20 = arith.constant 0 : index
    %25 = vector.load %arg10[%c0_19, %c0_20] : memref<128x1xf32, #tpu.memory_space<vmem>>, vector<128x1xf32>
    tpu.vector_store %arg10[%c0_19, %c0_20], %24 {strides = array<i32>} : memref<128x1xf32, #tpu.memory_space<vmem>>, vector<128x1xf32>,
    %c128_i32 = arith.constant 128 : i32
    %26 = arith.muli %arg0, %c128_i32 : i32
    %c256_i32 = arith.constant 256 : i32
    %27 = arith.muli %arg1, %c256_i32 : i32
    %c0_21 = arith.constant 0 : index
    %c0_22 = arith.constant 0 : index
    %28 = vector.load %arg7[%c0_21, %c0_22] : memref<128x1xf32, #tpu.memory_space<vmem>>, vector<128x1xf32>
    %c256_i32_23 = arith.constant 256 : i32
    %29 = arith.addi %27, %c256_i32_23 : i32
    %30 = arith.cmpi slt, %26, %29 : i32
    %c128_i32_24 = arith.constant 128 : i32
    %31 = arith.addi %26, %c128_i32_24 : i32
    %32 = arith.cmpi slt, %27, %31 : i32
    %33 = arith.andi %30, %32 : i1
    %c256_i32_25 = arith.constant 256 : i32
    %34 = arith.addi %27, %c256_i32_25 : i32
    %c8_i32 = arith.constant 8 : i32
    %35 = arith.cmpi sgt, %34, %c8_i32 : i32
    %36 = arith.ori %33, %35 : i1
    %true = arith.constant true
    %37 = arith.xori %36, %true : i1
    %38 = arith.extui %37 : i1 to i32
    %c0_i32_26 = arith.constant 0 : i32
    %39 = arith.cmpi ne, %38, %c0_i32_26 : i32
    scf.if %39 {
      %cst_30 = arith.constant dense<0xFF800000> : vector<128xf32>
      %45 = vector.multi_reduction <maximumf>, %5, %cst_30 [1] : vector<128x256xf32> to vector<128xf32>
      %46 = vector.shape_cast %45 : vector<128xf32> to vector<128x1xf32>
      %47 = arith.maximumf %28, %46 : vector<128x1xf32>
      %48 = vector.broadcast %47 : vector<128x1xf32> to vector<128x256xf32>
      %49 = arith.subf %5, %48 : vector<128x256xf32>
      %50 = math.exp %49 : vector<128x256xf32>
      %cst_31 = arith.constant dense<0.000000e+00> : vector<128xf32>
      %51 = vector.multi_reduction <add>, %50, %cst_31 [1] : vector<128x256xf32> to vector<128xf32>
      %52 = vector.shape_cast %51 : vector<128xf32> to vector<128x1xf32>
      %53 = arith.subf %28, %47 : vector<128x1xf32>
      %54 = math.exp %53 : vector<128x1xf32>
      %c0_32 = arith.constant 0 : index
      %c0_33 = arith.constant 0 : index
      %55 = vector.load %arg8[%c0_32, %c0_33] : memref<128x1xf32, #tpu.memory_space<vmem>>, vector<128x1xf32>
      %56 = arith.mulf %54, %55 : vector<128x1xf32>
      %57 = arith.addf %56, %52 : vector<128x1xf32>
      %c0_34 = arith.constant 0 : index
      %c0_35 = arith.constant 0 : index
      %58 = vector.load %arg8[%c0_34, %c0_35] : memref<128x1xf32, #tpu.memory_space<vmem>>, vector<128x1xf32>
      tpu.vector_store %arg8[%c0_34, %c0_35], %57 {strides = array<i32>} : memref<128x1xf32, #tpu.memory_space<vmem>>, vector<128x1xf32>,
      %c0_36 = arith.constant 0 : index
      %c0_37 = arith.constant 0 : index
      %59 = vector.load %arg7[%c0_36, %c0_37] : memref<128x1xf32, #tpu.memory_space<vmem>>, vector<128x1xf32>
      tpu.vector_store %arg7[%c0_36, %c0_37], %47 {strides = array<i32>} : memref<128x1xf32, #tpu.memory_space<vmem>>, vector<128x1xf32>,
    } else {
    }
    %40 = arith.extui %36 : i1 to i32
    %c0_i32_27 = arith.constant 0 : i32
    %41 = arith.cmpi ne, %40, %c0_i32_27 : i32
    scf.if %41 {
      %45 = tpu.iota {dimensions = array<i32: 0>} : vector<128x1xi32>
      %46 = vector.broadcast %26 : i32 to vector<128x1xi32>
      %47 = arith.addi %46, %45 : vector<128x1xi32>
      %48 = tpu.iota {dimensions = array<i32: 1>} : vector<1x256xi32>
      %49 = vector.broadcast %27 : i32 to vector<1x256xi32>
      %50 = arith.addi %49, %48 : vector<1x256xi32>
      %51 = vector.broadcast %47 : vector<128x1xi32> to vector<128x256xi32>
      %52 = vector.broadcast %50 : vector<1x256xi32> to vector<128x256xi32>
      %53 = arith.cmpi ne, %51, %52 : vector<128x256xi32>
      %c8_i32_30 = arith.constant 8 : i32
      %54 = vector.broadcast %c8_i32_30 : i32 to vector<1x256xi32>
      %55 = arith.cmpi slt, %50, %54 : vector<1x256xi32>
      %56 = vector.broadcast %55 : vector<1x256xi1> to vector<128x256xi1>
      %57 = arith.andi %53, %56 : vector<128x256xi1>
      %cst_31 = arith.constant -1.000000e+30 : f32
      %58 = vector.broadcast %cst_31 : f32 to vector<128x256xf32>
      %59 = arith.select %57, %5, %58 : vector<128x256xi1>, vector<128x256xf32>
      %cst_32 = arith.constant dense<0xFF800000> : vector<128xf32>
      %60 = vector.multi_reduction <maximumf>, %59, %cst_32 [1] : vector<128x256xf32> to vector<128xf32>
      %61 = vector.shape_cast %60 : vector<128xf32> to vector<128x1xf32>
      %62 = arith.maximumf %28, %61 : vector<128x1xf32>
      %63 = vector.broadcast %62 : vector<128x1xf32> to vector<128x256xf32>
      %64 = arith.subf %59, %63 : vector<128x256xf32>
      %65 = math.exp %64 : vector<128x256xf32>
      %cst_33 = arith.constant dense<0.000000e+00> : vector<128xf32>
      %66 = vector.multi_reduction <add>, %65, %cst_33 [1] : vector<128x256xf32> to vector<128xf32>
      %67 = vector.shape_cast %66 : vector<128xf32> to vector<128x1xf32>
      %68 = arith.subf %28, %62 : vector<128x1xf32>
      %69 = math.exp %68 : vector<128x1xf32>
      %c0_34 = arith.constant 0 : index
      %c0_35 = arith.constant 0 : index
      %70 = vector.load %arg8[%c0_34, %c0_35] : memref<128x1xf32, #tpu.memory_space<vmem>>, vector<128x1xf32>
      %71 = arith.mulf %69, %70 : vector<128x1xf32>
      %72 = arith.addf %71, %67 : vector<128x1xf32>
      %c0_36 = arith.constant 0 : index
      %c0_37 = arith.constant 0 : index
      %73 = vector.load %arg8[%c0_36, %c0_37] : memref<128x1xf32, #tpu.memory_space<vmem>>, vector<128x1xf32>
      tpu.vector_store %arg8[%c0_36, %c0_37], %72 {strides = array<i32>} : memref<128x1xf32, #tpu.memory_space<vmem>>, vector<128x1xf32>,
      %c0_38 = arith.constant 0 : index
      %c0_39 = arith.constant 0 : index
      %74 = vector.load %arg7[%c0_38, %c0_39] : memref<128x1xf32, #tpu.memory_space<vmem>>, vector<128x1xf32>
      tpu.vector_store %arg7[%c0_38, %c0_39], %62 {strides = array<i32>} : memref<128x1xf32, #tpu.memory_space<vmem>>, vector<128x1xf32>,
    } else {
    }
    %c0_i32_28 = arith.constant 0 : i32
    %42 = arith.cmpi eq, %arg1, %c0_i32_28 : i32
    %43 = arith.extui %42 : i1 to i32
    %c0_i32_29 = arith.constant 0 : i32
    %44 = arith.cmpi ne, %43, %c0_i32_29 : i32
    scf.if %44 {
      %c0_30 = arith.constant 0 : index
      %c0_31 = arith.constant 0 : index
      %45 = vector.load %arg10[%c0_30, %c0_31] : memref<128x1xf32, #tpu.memory_space<vmem>>, vector<128x1xf32>
      %c0_32 = arith.constant 0 : index
      %c0_33 = arith.constant 0 : index
      %46 = vector.load %arg9[%c0_32, %c0_33] : memref<128x1xf32, #tpu.memory_space<vmem>>, vector<128x1xf32>
      %c0_34 = arith.constant 0 : index
      %c0_35 = arith.constant 0 : index
      %47 = vector.load %arg7[%c0_34, %c0_35] : memref<128x1xf32, #tpu.memory_space<vmem>>, vector<128x1xf32>
      %48 = arith.mulf %45, %47 : vector<128x1xf32>
      %49 = arith.subf %46, %48 : vector<128x1xf32>
      %c0_36 = arith.constant 0 : index
      %c0_37 = arith.constant 0 : index
      %50 = vector.load %arg8[%c0_36, %c0_37] : memref<128x1xf32, #tpu.memory_space<vmem>>, vector<128x1xf32>
      %51 = math.log %50 : vector<128x1xf32>
      %52 = arith.mulf %45, %51 : vector<128x1xf32>
      %53 = arith.subf %49, %52 : vector<128x1xf32>
      %cst_38 = arith.constant 1.000000e+00 : f32
      %54 = vector.broadcast %cst_38 : f32 to vector<128x1xf32>
      %55 = arith.maximumf %45, %54 : vector<128x1xf32>
      %56 = arith.divf %53, %55 : vector<128x1xf32>
      %c0_39 = arith.constant 0 : index
      %c0_40 = arith.constant 0 : index
      %57 = vector.load %arg6[%c0_39, %c0_40] : memref<128x1xf32, #tpu.memory_space<vmem>>, vector<128x1xf32>
      tpu.vector_store %arg6[%c0_39, %c0_40], %56 {strides = array<i32>} : memref<128x1xf32, #tpu.memory_space<vmem>>, vector<128x1xf32>,
    } else {
    }
    return
  }
  func.func @transform_0(%arg0: i32, %arg1: i32) -> (i32, i32) {
    %c0_i32 = arith.constant 0 : i32
    %c0_i32_0 = arith.constant 0 : i32
    return %arg0, %c0_i32 : i32, i32
  }
  func.func @transform_1(%arg0: i32, %arg1: i32) -> (i32, i32) {
    %c0_i32 = arith.constant 0 : i32
    %c0_i32_0 = arith.constant 0 : i32
    return %c0_i32, %arg1 : i32, i32
  }
  func.func @transform_2(%arg0: i32, %arg1: i32) -> (i32, i32) {
    %c0_i32 = arith.constant 0 : i32
    %c0_i32_0 = arith.constant 0 : i32
    return %arg0, %c0_i32 : i32, i32
  }
  func.func @transform_3(%arg0: i32, %arg1: i32) -> (i32, i32) {
    %c0_i32 = arith.constant 0 : i32
    %c0_i32_0 = arith.constant 0 : i32
    return %c0_i32, %arg1 : i32, i32
  }
  func.func @transform_4(%arg0: i32, %arg1: i32) -> (i32, i32) {
    %c0_i32 = arith.constant 0 : i32
    %c0_i32_0 = arith.constant 0 : i32
    return %arg0, %c0_i32 : i32, i32
  }
}

</mosaic_0001>

<bundles_post_ra>
// kernel: tpu_custom_call.1
= control target key start
LH: loop header
LB: loop body
LE: loop exit
PB: predicated region body
PF: predicated region fallthrough
CT: control target
= control target key end

     0   :  { %s2599_s15 = smov 0   ;;  %s2601_s16 = smov 0   ;;  %s3873_s0 = inlined_call_operand.vmem [shape: bf16[256,32], index: 0, kind: input, shape index: {}]   ;;  %s3874_s1 = inlined_call_operand.vmem [shape: bf16[32,256], index: 1, kind: input, shape index: {}]   ;;  %s3875_s2 = inlined_call_operand.vmem [shape: s32[256,1], index: 2, kind: input, shape index: {}]   ;;  %s3876_s3 = inlined_call_operand.vmem [shape: s32[1,256], index: 3, kind: input, shape index: {}]   ;;  %s3877_s4 = inlined_call_operand.vmem [shape: f32[256,1], index: 4, kind: output, shape index: {}]  }
   0x1   :  { %s2603_s17 = smov 0  }
   0x2 LB: > { %s26_s18 = sadd.s32 1, %s2565_s16  ;;  %p2286_p0 = scmp.ge.s32.totalorder %s2569_s17, 1  ;;  %s2569_s17 = sphi %s2603_s17, %s14_s17   ;;  %s2565_s16 = sphi %s2601_s16, %s4078_s16   ;;  %s2561_s15 = sphi %s2599_s15, %s4077_s15  }
   0x3   : > { %p28_p1 = scmp.ge.s32.totalorder %s26_s18, 2  ;;  %p207_p2 = scmp.lt.s32.totalorder %s2569_s17, 3 }
   0x5   : > { %s4080_s18 = smov (%p28_p1, %s26_s18), 0  ;;  %p208_p3 = pnand %p2286_p0, %p207_p2 }
   0x7   : > { %211 = sbr.rel (%p208_p3) target bundleno = 759 (0x2f7), region = 36 }
   0xe   : > { %v2381_v0 = vld [vmem:[%s3874_s1 + $0x4] ss:$8 sps:$4 sm:$0xff]   ;;  %s2287_s21 = sshll.u32 %s2561_s15, 4  ;;  %v2383_v1 = vld [vmem:[%s3874_s1] ss:$8 sps:$4 sm:$0xff]   ;;  %v2571_v2 = vmov 0  }
   0xf   : > { %500 = vmatprep.mubr.bf16.mxu0 %v2571_v2  ;;  %540 = vmatprep.mubr.bf16.mxu1 %v2571_v2  ;;  %p248_p4 = scmp.lt.s32.totalorder %s2287_s21, 31  ;;  %v2384_v3 = vld [vmem:[%s3874_s1 + $0x14] ss:$8 sps:$4 sm:$0xff]   ;;  %v2386_v4 = vld [vmem:[%s3874_s1 + $0x10] ss:$8 sps:$4 sm:$0xff]   ;;  %vm402_vm0 = vcmask 261120  }
  0x10   : > { %468 = vmatprep.subr.bf16.mxu0 %v2381_v0  ;;  %2348 = vmatprep.subr.bf16.mxu1 %v2381_v0  ;;  %vm3878_vm9 = vcmask 7168   ;;  %s2305_s12 = sshll.u32 %s2561_s15, 7 }
  0x11   : > { %469 = vmatpush1.bf16.msra.mxu0 %v2383_v1  ;;  %2350 = vmatpush1.bf16.msra.mxu1 %v2383_v1  ;;  %s4082_s21 = smov (!%p248_p4, %s2287_s21), 31 }
  0x12   : > { %470 = vmatprep.subr.bf16.mxu0 %v2384_v3  ;;  %2349 = vmatprep.subr.bf16.mxu1 %v2384_v3  ;;  %s2288_s28 = sshll.u32 %s4082_s21, 2  ;;  %s2290_s29 = sshll.u32 %s4082_s21, 3 }
  0x13   : > { %2379 = vset.pattern.permute.xlu0 %v2571_v2  ;;  %2380 = vset.pattern.permute.xlu1 %v2571_v2  ;;  %s251_s6 = scalar_lea.vmem %s3873_s0, %s2288_s28  ;;  %s2648_s9 = scalar_lea.vmem %s3875_s2, %s2290_s29 }
  0x14   : > { %v2310_v5 = vld [vmem:[%s251_s6] sm:$0xff]   ;;  %v2341_v7 = vld [vmem:[%s251_s6 + $0x8] sm:$0xff]   ;;  %v2342_v13 = vld [vmem:[%s251_s6 + $0x10] sm:$0xff]   ;;  %s3734_s15 = scalar_lea.vmem %s3877_s4, %s2290_s29 }
  0x15   : > { %471 = vmatpush1.bf16.msra.mxu0 %v2386_v4  ;;  %2351 = vmatpush1.bf16.msra.mxu1 %v2386_v4  ;;  %v2344_v6 = vld [vmem:[%s251_s6 + $0x20] sm:$0xff]   ;;  %v2311_v8 = vunpack.c.l.bf16 %v2310_v5  ;;  %v2312_v9 = vunpack.c.h.bf16 %v2310_v5  ;;  %v2345_v12 = vld [vmem:[%s251_s6 + $0x28] sm:$0xff]   ;;  %v2315_v14 = vunpack.c.l.bf16 %v2341_v7  ;;  %v2316_v15 = vunpack.c.h.bf16 %v2341_v7  ;;  %v2346_v18 = vld [vmem:[%s251_s6 + $0x30] sm:$0xff]  }
  0x16   : > { %v2327_v10 = vunpack.c.l.bf16 %v2344_v6  ;;  %v2328_v11 = vunpack.c.h.bf16 %v2344_v6  ;;  %v2331_v16 = vunpack.c.l.bf16 %v2345_v12  ;;  %v2332_v17 = vunpack.c.h.bf16 %v2345_v12  ;;  %v2343_v19 = vld [vmem:[%s251_s6 + $0x18] sm:$0xff]   ;;  %v581_v20 = vld [vmem:[%s2648_s9] sm:$0xff]  ;;  %v582_v38 = vld [vmem:[%s2648_s9 + $0x8] sm:$0xff] }
  0x17   : > { %v378_v21 = vmul.f32 14.285714, %v2311_v8  ;;  %v379_v22 = vmul.f32 14.285714, %v2312_v9  ;;  %v2319_v24 = vunpack.c.l.bf16 %v2342_v13  ;;  %v2347_v25 = vld [vmem:[%s251_s6 + $0x38] sm:$0xff]   ;;  %599 = vperm.xlu0 %2379, %v581_v20   ;;  %v2320_v29 = vunpack.c.h.bf16 %v2342_v13  ;;  %v583_v39 = vld [vmem:[%s2648_s9 + $0x10] sm:$0xff] }
  0x18   : > { %v386_v23 = vmul.f32 14.285714, %v2327_v10  ;;  %v387_v26 = vmul.f32 14.285714, %v2328_v11  ;;  %v380_v27 = vmul.f32 14.285714, %v2315_v14  ;;  %v2335_v37 = vunpack.c.l.bf16 %v2346_v18  ;;  %605 = vperm.xlu1 %2380, %v583_v39  }
  0x19   : > { %v381_v28 = vmul.f32 14.285714, %v2316_v15  ;;  %v394_v30 = vpack.c.bf16 %v379_v22, %v378_v21  ;;  %v388_v31 = vmul.f32 14.285714, %v2331_v16  ;;  %v389_v32 = vmul.f32 14.285714, %v2332_v17 }
  0x1a   : > { %v382_v33 = vmul.f32 14.285714, %v2319_v24  ;;  %v398_v34 = vpack.c.bf16 %v387_v26, %v386_v23  ;;  %v383_v36 = vmul.f32 14.285714, %v2320_v29  ;;  %v2336_v41 = vunpack.c.h.bf16 %v2346_v18  ;;  %v585_v48 = vld [vmem:[%s2648_s9 + $0x20] sm:$0xff]  ;;  %v584_v49 = vld [vmem:[%s2648_s9 + $0x18] sm:$0xff] }
  0x1b   : > { %v395_v35 = vpack.c.bf16 %v381_v28, %v380_v27  ;;  %403 = vst.msk [vmem:[#allocation6] sm:$0xff] %vm402_vm0, %v394_v30  ;;  %v399_v40 = vpack.c.bf16 %v389_v32, %v388_v31  ;;  %v2323_v42 = vunpack.c.l.bf16 %v2343_v19  ;;  %v2324_v43 = vunpack.c.h.bf16 %v2343_v19  ;;  %602 = vperm.xlu0 %2379, %v582_v38   ;;  %v587_v58 = vld [vmem:[%s2648_s9 + $0x30] sm:$0xff]  ;;  %v586_v60 = vld [vmem:[%s2648_s9 + $0x28] sm:$0xff]  ;;  %v589_v62 = vld [vmem:[%s2648_s9 + $0x40] sm:$0xff] }
  0x1c   : > { %407 = vst.msk [vmem:[#allocation6 + $0x20] sm:$0xff] %vm402_vm0, %v398_v34  ;;  %v396_v44 = vpack.c.bf16 %v383_v36, %v382_v33  ;;  %v390_v45 = vmul.f32 14.285714, %v2335_v37  ;;  %v2339_v46 = vunpack.c.l.bf16 %v2347_v25  ;;  %v2340_v47 = vunpack.c.h.bf16 %v2347_v25  ;;  %608 = vperm.xlu1 %2380, %v584_v49   ;;  %v588_v63 = vld [vmem:[%s2648_s9 + $0x38] sm:$0xff]  ;;  %v591_v1 = vld [vmem:[%s2648_s9 + $0x50] sm:$0xff]  ;;  %v590_v4 = vld [vmem:[%s2648_s9 + $0x48] sm:$0xff] }
  0x1d   : > { %404 = vst.msk [vmem:[#allocation6 + $0x8] sm:$0xff] %vm402_vm0, %v395_v35  ;;  %408 = vst.msk [vmem:[#allocation6 + $0x28] sm:$0xff] %vm402_vm0, %v399_v40  ;;  %v391_v50 = vmul.f32 14.285714, %v2336_v41  ;;  %v384_v51 = vmul.f32 14.285714, %v2323_v42  ;;  %v646_v13 = vlaneseq  ;;  %v2870_v38 = vstv %s2305_s12 }
  0x1e   : > { %v385_v52 = vmul.f32 14.285714, %v2324_v43  ;;  %405 = vst.msk [vmem:[#allocation6 + $0x10] sm:$0xff] %vm402_vm0, %v396_v44  ;;  %v392_v53 = vmul.f32 14.285714, %v2339_v46  ;;  %v594_v5 = vld [vmem:[%s2648_s9 + $0x68] sm:$0xff] }
  0x1f   : > { %v393_v54 = vmul.f32 14.285714, %v2340_v47  ;;  %v400_v55 = vpack.c.bf16 %v391_v50, %v390_v45  ;;  %611 = vperm.xlu0 %2379, %v585_v48   ;;  %v592_v6 = vld [vmem:[%s2648_s9 + $0x58] sm:$0xff]  ;;  %v595_v8 = vld [vmem:[%s2648_s9 + $0x70] sm:$0xff]  ;;  %v593_v10 = vld [vmem:[%s2648_s9 + $0x60] sm:$0xff]  ;;  %v2688_v14 = vshrl.u32 %v646_v13, 7 }
  0x20   : > { %v397_v56 = vpack.c.bf16 %v385_v52, %v384_v51  ;;  %614 = vperm.xlu1 %2380, %v586_v60   ;;  %v597_v17 = vld [vmem:[%s3876_s3] sm:$0x3]  ;;  %v3889_v20 = vmov 0.0   ;;  %v2573_v36 = vmov -1e+30   ;;  %v2878_v42 = vand.u32 127, %v646_v13 }
  0x21   : > { %v401_v57 = vpack.c.bf16 %v393_v54, %v392_v53  ;;  %409 = vst.msk [vmem:[#allocation6 + $0x30] sm:$0xff] %vm402_vm0, %v400_v55  ;;  %v648_v15 = vsub.s32 0, %v2688_v14  ;;  %v652_v16 = vsub.s32 1, %v2688_v14  ;;  %v981_v40 = vadd.s32 64, %v2688_v14 }
  0x22   : > { %406 = vst.msk [vmem:[#allocation6 + $0x18] sm:$0xff] %vm402_vm0, %v397_v56  ;;  %v411_v59 = vld [vmem:[#allocation6] sm:$0xff]  ;;  %v990_v41 = vadd.s32 %v2870_v38, %v2688_v14  ;;  %v974_v43 = vadd.s32 8, %v2688_v14  ;;  %v982_v44 = vadd.s32 72, %v2688_v14  ;;  %v983_v45 = vadd.s32 80, %v2688_v14 }
  0x23   : > { %410 = vst.msk [vmem:[#allocation6 + $0x38] sm:$0xff] %vm402_vm0, %v401_v57  ;;  %2297 = vmatmul.mubr.msk.bf16.vlgmr.msra.gmra.mrb[0].mxu0 %vm402_vm0, %v411_v59  ;;  %v415_v61 = vld [vmem:[#allocation6 + $0x20] sm:$0xff]  ;;  %617 = vperm.xlu0 %2379, %v587_v58   ;;  %v2697_v18 = vrot.slane %v597_v17, %v652_v16  ;;  %v998_v46 = vadd.s32 %v2870_v38, %v981_v40  ;;  %vm1044_vm11 = vcmp.lt.s32.totalorder %v2878_v42, 8  ;;  %v975_v52 = vadd.s32 16, %v2688_v14 }
  0x24   : > { %2301 = vmatmul.mubr.msk.bf16.vlgmr.msra.gmra.mrb[0].mxu1 %vm402_vm0, %v415_v61  ;;  %510 = vmatprep.mubr.bf16.mxu0 %v2571_v2  ;;  %v412_v0 = vld [vmem:[#allocation6 + $0x8] sm:$0xff]  ;;  %331 = vst.msk [vmem:[#allocation5 + $0x8] sm:$0xff] %vm3878_vm9, %v3889_v20  ;;  %298 = vst.msk [vmem:[#allocation3] sm:$0xff] %vm3878_vm9, %v3889_v20  ;;  %vm1012_vm10 = vcmp.ne.s32.totalorder %v990_v41, %v2878_v42  ;;  %v991_v49 = vadd.s32 %v2870_v38, %v974_v43  ;;  %v976_v53 = vadd.s32 24, %v2688_v14 }
  0x25   : > { %550 = vmatprep.mubr.bf16.mxu1 %v2571_v2  ;;  %v416_v3 = vld [vmem:[#allocation6 + $0x28] sm:$0xff]  ;;  %620 = vperm.xlu1 %2380, %v588_v63   ;;  %v413_v7 = vld [vmem:[#allocation6 + $0x10] sm:$0xff]  ;;  %299 = vst.msk [vmem:[#allocation3 + $0x8] sm:$0xff] %vm3878_vm9, %v3889_v20  ;;  %300 = vst.msk [vmem:[#allocation3 + $0x10] sm:$0xff] %vm3878_vm9, %v3889_v20  ;;  %v999_v50 = vadd.s32 %v2870_v38, %v982_v44  ;;  %v1000_v51 = vadd.s32 %v2870_v38, %v983_v45  ;;  %v984_v54 = vadd.s32 88, %v2688_v14 }
  0x26   : > { %301 = vst.msk [vmem:[#allocation3 + $0x18] sm:$0xff] %vm3878_vm9, %v3889_v20  ;;  %302 = vst.msk [vmem:[#allocation3 + $0x20] sm:$0xff] %vm3878_vm9, %v3889_v20  ;;  %vm1028_vm12 = vcmp.ne.s32.totalorder %v998_v46, %v2878_v42  ;;  %v985_v55 = vadd.s32 96, %v2688_v14  ;;  %v977_v56 = vadd.s32 32, %v2688_v14  ;;  %vm1014_vm14 = vcmp.ne.s32.totalorder %v991_v49, %v2878_v42 }
  0x27   : > { %623 = vperm.xlu0 %2379, %v589_v62   ;;  %303 = vst.msk [vmem:[#allocation3 + $0x28] sm:$0xff] %vm3878_vm9, %v3889_v20  ;;  %304 = vst.msk [vmem:[#allocation3 + $0x30] sm:$0xff] %vm3878_vm9, %v3889_v20  ;;  %v992_v60 = vadd.s32 %v2870_v38, %v975_v52  ;;  %v2918_v61 = vadd.s32 %v2870_v38, %v976_v53  ;;  %v986_v43 = vadd.s32 104, %v2688_v14  ;;  %v987_v49 = vadd.s32 112, %v2688_v14 }
  0x28   : > { %v417_v9 = vld [vmem:[#allocation6 + $0x30] sm:$0xff]  ;;  %305 = vst.msk [vmem:[#allocation3 + $0x38] sm:$0xff] %vm3878_vm9, %v3889_v20  ;;  %306 = vst.msk [vmem:[#allocation3 + $0x40] sm:$0xff] %vm3878_vm9, %v3889_v20 }
  0x29   : > { %626 = vperm.xlu1 %2380, %v590_v4   ;;  %v414_v11 = vld [vmem:[#allocation6 + $0x18] sm:$0xff]  ;;  %307 = vst.msk [vmem:[#allocation3 + $0x48] sm:$0xff] %vm3878_vm9, %v3889_v20  ;;  %308 = vst.msk [vmem:[#allocation3 + $0x50] sm:$0xff] %vm3878_vm9, %v3889_v20  ;;  %v978_v4 = vadd.s32 40, %v2688_v14 }
  0x2a   : > { %v418_v12 = vld [vmem:[#allocation6 + $0x38] sm:$0xff]  ;;  %309 = vst.msk [vmem:[#allocation3 + $0x58] sm:$0xff] %vm3878_vm9, %v3889_v20  ;;  %310 = vst.msk [vmem:[#allocation3 + $0x60] sm:$0xff] %vm3878_vm9, %v3889_v20 }
  0x2b   : > { %2298 = vmatmul.mubr.msk.bf16.gmra.mrb[4].mxu0 %vm402_vm0, %v412_v0  ;;  %629 = vperm.xlu0 %2379, %v591_v1   ;;  %311 = vst.msk [vmem:[#allocation3 + $0x68] sm:$0xff] %vm3878_vm9, %v3889_v20  ;;  %312 = vst.msk [vmem:[#allocation3 + $0x70] sm:$0xff] %vm3878_vm9, %v3889_v20  ;;  %v2923_v0 = vadd.s32 %v2870_v38, %v984_v54  ;;  %v2926_v1 = vadd.s32 %v2870_v38, %v985_v55 }
  0x2c   : > { %2302 = vmatmul.mubr.msk.bf16.gmra.mrb[4].mxu1 %vm402_vm0, %v416_v3  ;;  %520 = vmatprep.mubr.bf16.mxu0 %v2571_v2  ;;  %313 = vst.msk [vmem:[#allocation3 + $0x78] sm:$0xff] %vm3878_vm9, %v3889_v20  ;;  %314 = vst.msk [vmem:[#allocation4] sm:$0xff] %vm3878_vm9, %v3889_v20  ;;  %v2929_v3 = vadd.s32 %v2870_v38, %v977_v56  ;;  %v3013_v41 = vadd.s32 %v2870_v38, %v978_v4 }
  0x2d   : > { %560 = vmatprep.mubr.bf16.mxu1 %v2571_v2  ;;  %632 = vperm.xlu1 %2380, %v592_v6   ;;  %315 = vst.msk [vmem:[#allocation4 + $0x8] sm:$0xff] %vm3878_vm9, %v3889_v20  ;;  %316 = vst.msk [vmem:[#allocation4 + $0x10] sm:$0xff] %vm3878_vm9, %v3889_v20 }
  0x2e   : > { %317 = vst.msk [vmem:[#allocation4 + $0x18] sm:$0xff] %vm3878_vm9, %v3889_v20  ;;  %318 = vst.msk [vmem:[#allocation4 + $0x20] sm:$0xff] %vm3878_vm9, %v3889_v20 }
  0x2f   : > { %638 = vperm.xlu0 %2379, %v594_v5   ;;  %319 = vst.msk [vmem:[#allocation4 + $0x28] sm:$0xff] %vm3878_vm9, %v3889_v20  ;;  %320 = vst.msk [vmem:[#allocation4 + $0x30] sm:$0xff] %vm3878_vm9, %v3889_v20 }
  0x30   : > { %321 = vst.msk [vmem:[#allocation4 + $0x38] sm:$0xff] %vm3878_vm9, %v3889_v20  ;;  %322 = vst.msk [vmem:[#allocation4 + $0x40] sm:$0xff] %vm3878_vm9, %v3889_v20 }
  0x31   : > { %635 = vperm.xlu1 %2380, %v593_v10   ;;  %323 = vst.msk [vmem:[#allocation4 + $0x48] sm:$0xff] %vm3878_vm9, %v3889_v20  ;;  %324 = vst.msk [vmem:[#allocation4 + $0x50] sm:$0xff] %vm3878_vm9, %v3889_v20 }
  0x32   : > { %325 = vst.msk [vmem:[#allocation4 + $0x58] sm:$0xff] %vm3878_vm9, %v3889_v20  ;;  %326 = vst.msk [vmem:[#allocation4 + $0x60] sm:$0xff] %vm3878_vm9, %v3889_v20 }
  0x33   : > { %2299 = vmatmul.mubr.msk.bf16.gmra.mrb[8].mxu0 %vm402_vm0, %v413_v7  ;;  %641 = vperm.xlu0 %2379, %v595_v8   ;;  %327 = vst.msk [vmem:[#allocation4 + $0x68] sm:$0xff] %vm3878_vm9, %v3889_v20  ;;  %328 = vst.msk [vmem:[#allocation4 + $0x70] sm:$0xff] %vm3878_vm9, %v3889_v20 }
  0x34   : > { %2303 = vmatmul.mubr.msk.bf16.gmra.mrb[8].mxu1 %vm402_vm0, %v417_v9  ;;  %530 = vmatprep.mubr.bf16.mxu0 %v2571_v2  ;;  %329 = vst.msk [vmem:[#allocation4 + $0x78] sm:$0xff] %vm3878_vm9, %v3889_v20  ;;  %330 = vst.msk [vmem:[#allocation5] sm:$0xff] %vm3878_vm9, %v3889_v20  ;;  %v979_v9 = vadd.s32 48, %v2688_v14 }
  0x35   : > { %570 = vmatprep.mubr.bf16.mxu1 %v2571_v2  ;;  %v2695_v2 = vrot.slane %v597_v17, %v648_v15  ;;  %332 = vst.msk [vmem:[#allocation5 + $0x10] sm:$0xff] %vm3878_vm9, %v3889_v20  ;;  %333 = vst.msk [vmem:[#allocation5 + $0x18] sm:$0xff] %vm3878_vm9, %v3889_v20 }
  0x36   : > { %334 = vst.msk [vmem:[#allocation5 + $0x20] sm:$0xff] %vm3878_vm9, %v3889_v20  ;;  %335 = vst.msk [vmem:[#allocation5 + $0x28] sm:$0xff] %vm3878_vm9, %v3889_v20 }
  0x37   : > { %336 = vst.msk [vmem:[#allocation5 + $0x30] sm:$0xff] %vm3878_vm9, %v3889_v20  ;;  %337 = vst.msk [vmem:[#allocation5 + $0x38] sm:$0xff] %vm3878_vm9, %v3889_v20 }
  0x38   : > { %338 = vst.msk [vmem:[#allocation5 + $0x40] sm:$0xff] %vm3878_vm9, %v3889_v20  ;;  %339 = vst.msk [vmem:[#allocation5 + $0x48] sm:$0xff] %vm3878_vm9, %v3889_v20 }
  0x39   : > { %340 = vst.msk [vmem:[#allocation5 + $0x50] sm:$0xff] %vm3878_vm9, %v3889_v20  ;;  %341 = vst.msk [vmem:[#allocation5 + $0x58] sm:$0xff] %vm3878_vm9, %v3889_v20 }
  0x3a   : > { %342 = vst.msk [vmem:[#allocation5 + $0x60] sm:$0xff] %vm3878_vm9, %v3889_v20  ;;  %343 = vst.msk [vmem:[#allocation5 + $0x68] sm:$0xff] %vm3878_vm9, %v3889_v20 }
  0x3b   : > { %2300 = vmatmul.mubr.msk.bf16.gmra.mrb[12].mxu0 %vm402_vm0, %v414_v11  ;;  %344 = vst.msk [vmem:[#allocation5 + $0x70] sm:$0xff] %vm3878_vm9, %v3889_v20  ;;  %345 = vst.msk [vmem:[#allocation5 + $0x78] sm:$0xff] %vm3878_vm9, %v3889_v20 }
  0x3c   : > { %2304 = vmatmul.mubr.msk.bf16.gmra.mrb[12].mxu1 %vm402_vm0, %v418_v12  ;;  %290 = vst.msk [vmem:[#allocation2 + $0x40] sm:$0xff] %vm3878_vm9, %v2573_v36  ;;  %282 = vst.msk [vmem:[#allocation2] sm:$0xff] %vm3878_vm9, %v2573_v36  ;;  %vm1030_vm0 = vcmp.ne.s32.totalorder %v999_v50, %v2878_v42  ;;  %v3026_v50 = vadd.s32 %v2870_v38, %v979_v9 }
  0x3d   : > { %283 = vst.msk [vmem:[#allocation2 + $0x8] sm:$0xff] %vm3878_vm9, %v2573_v36  ;;  %284 = vst.msk [vmem:[#allocation2 + $0x10] sm:$0xff] %vm3878_vm9, %v2573_v36 }
  0x3e   : > { %285 = vst.msk [vmem:[#allocation2 + $0x18] sm:$0xff] %vm3878_vm9, %v2573_v36  ;;  %286 = vst.msk [vmem:[#allocation2 + $0x20] sm:$0xff] %vm3878_vm9, %v2573_v36 }
  0x3f   : > { %287 = vst.msk [vmem:[#allocation2 + $0x28] sm:$0xff] %vm3878_vm9, %v2573_v36  ;;  %288 = vst.msk [vmem:[#allocation2 + $0x30] sm:$0xff] %vm3878_vm9, %v2573_v36 }
  0x40   : > { %289 = vst.msk [vmem:[#allocation2 + $0x38] sm:$0xff] %vm3878_vm9, %v2573_v36  ;;  %291 = vst.msk [vmem:[#allocation2 + $0x48] sm:$0xff] %vm3878_vm9, %v2573_v36 }
  0x41   : > { %292 = vst.msk [vmem:[#allocation2 + $0x50] sm:$0xff] %vm3878_vm9, %v2573_v36  ;;  %293 = vst.msk [vmem:[#allocation2 + $0x58] sm:$0xff] %vm3878_vm9, %v2573_v36 }
  0x42   : > { %294 = vst.msk [vmem:[#allocation2 + $0x60] sm:$0xff] %vm3878_vm9, %v2573_v36  ;;  %295 = vst.msk [vmem:[#allocation2 + $0x68] sm:$0xff] %vm3878_vm9, %v2573_v36 }
  0x43   : > { %296 = vst.msk [vmem:[#allocation2 + $0x70] sm:$0xff] %vm3878_vm9, %v2573_v36  ;;  %297 = vst.msk [vmem:[#allocation2 + $0x78] sm:$0xff] %vm3878_vm9, %v2573_v36  ;;  %vm1032_vm9 = vcmp.ne.s32.totalorder %v1000_v51, %v2878_v42 }
  0x44   : > { %vm2901_vm13 = vmand %vm1012_vm10, %vm1044_vm11 }
  0x45   : > { %vm2910_vm15 = vmand %vm1028_vm12, %vm1044_vm11 }
  0x96   : > { %v2699_v19 = vpop.permute.xlu0 %599 }
  0x97   : > { %vm654_vm1 = vcmp.eq.s32.totalorder %v2699_v19, %v2695_v2  ;;  %vm655_vm2 = vcmp.eq.s32.totalorder %v2699_v19, %v2697_v18  ;;  %v2715_v25 = vpop.permute.xlu1 %605 }
  0x98   : > { %v831_v21 = vsel %vm654_vm1, 1.0, %v3889_v20  ;;  %v832_v22 = vsel %vm655_vm2, 1.0, %v3889_v20  ;;  %vm658_vm5 = vcmp.eq.s32.totalorder %v2715_v25, %v2695_v2  ;;  %vm659_vm6 = vcmp.eq.s32.totalorder %v2715_v25, %v2697_v18 }
  0x99   : > { %v863_v23 = vadd.f32 %v832_v22, %v831_v21  ;;  %v835_v28 = vsel %vm658_vm5, 1.0, %v3889_v20  ;;  %v836_v29 = vsel %vm659_vm6, 1.0, %v3889_v20 }
  0x9a   : > { %v2713_v24 = vpop.permute.xlu0 %602  ;;  %v869_v31 = vadd.f32 %v836_v29, %v835_v28 }
  0x9b   : > { %vm656_vm3 = vcmp.eq.s32.totalorder %v2713_v24, %v2695_v2  ;;  %vm657_vm4 = vcmp.eq.s32.totalorder %v2713_v24, %v2697_v18  ;;  %864 = vadd.xlane.f32.xlu0 %v863_v23  ;;  %v2741_v32 = vpop.permute.xlu1 %608 }
  0x9c   : > { %v833_v26 = vsel %vm656_vm3, 1.0, %v3889_v20  ;;  %v834_v27 = vsel %vm657_vm4, 1.0, %v3889_v20  ;;  %vm660_vm7 = vcmp.eq.s32.totalorder %v2741_v32, %v2695_v2  ;;  %vm661_vm8 = vcmp.eq.s32.totalorder %v2741_v32, %v2697_v18 }
  0x9d   : > { %v866_v30 = vadd.f32 %v834_v27, %v833_v26  ;;  %v837_v33 = vsel %vm660_vm7, 1.0, %v3889_v20  ;;  %v838_v34 = vsel %vm661_vm8, 1.0, %v3889_v20 }
  0x9e   : > { %v872_v35 = vadd.f32 %v838_v34, %v837_v33  ;;  %v2868_v37 = vpop.permute.xlu0 %611 }
  0x9f   : > { %867 = vadd.xlane.f32.xlu1 %v866_v30  ;;  %870 = vadd.xlane.f32.xlu0 %v869_v31  ;;  %v2872_v39 = vpop.permute.xlu1 %614 }
  0xa2   : > { %v2884_v47 = vpop.permute.xlu0 %617 }
  0xa3   : > { %873 = vadd.xlane.f32.xlu1 %v872_v35 }
  0xa4   : > { %v2886_v48 = vpop.permute.xlu1 %620 }
  0xa6   : > { %v2906_v58 = vpop.permute.xlu0 %623 }
  0xa7   : > { %vm670_vm10 = vcmp.eq.s32.totalorder %v2906_v58, %v2695_v2 }
  0xa8   : > { %v2920_v62 = vpop.permute.xlu1 %626 }
  0xa9   : > { %vm3880_vm12 = vcmp.eq.s32.totalorder %v2920_v62, %v2695_v2 }
  0xaa   : > { %v2998_v36 = vpop.permute.xlu0 %629 }
  0xac   : > { %v3016_v44 = vpop.permute.xlu1 %632 }
  0xf6   : > { %v502_v63 = vpop.f32.mrb[0].mxu0 }
  0xf7   : > { %v702_v5 = vsel %vm654_vm1, %v502_v63, 0.0  ;;  %v2939_v6 = vsel %vm2901_vm13, %v502_v63, -1e+30  ;;  %v542_v7 = vpop.f32.mrb[0].mxu1  ;;  %v504_v8 = vpop.f32.mrb[1].mxu0  ;;  %vm3881_vm1 = vcmp.eq.s32.totalorder %v2906_v58, %v2697_v18  ;;  %vm2980_vm13 = vmand %vm1030_vm0, %vm1044_vm11  ;;  %vm1034_vm0 = vcmp.ne.s32.totalorder %v2923_v0, %v2878_v42 }
  0xf8   : > { %v718_v10 = vsel %vm670_vm10, %v542_v7, 0.0  ;;  %v2947_v11 = vsel %vm2910_vm15, %v542_v7, -1e+30  ;;  %v703_v12 = vsel %vm655_vm2, %v504_v8, 0.0  ;;  %v544_v13 = vpop.f32.mrb[1].mxu1  ;;  %v506_v15 = vpop.f32.mrb[2].mxu0  ;;  %vm1052_vm2 = vmand %vm1014_vm14, %vm1044_vm11  ;;  %vm1018_vm14 = vcmp.ne.s32.totalorder %v2918_v61, %v2878_v42 }
  0xf9   : > { %v719_v16 = vsel %vm3881_vm1, %v544_v13, 0.0  ;;  %v704_v17 = vsel %vm656_vm3, %v506_v15, 0.0  ;;  %v546_v19 = vpop.f32.mrb[2].mxu1  ;;  %v508_v21 = vpop.f32.mrb[3].mxu0  ;;  %v734_v22 = vadd.f32 %v703_v12, %v702_v5  ;;  %vm3879_vm3 = vcmp.eq.s32.totalorder %v2920_v62, %v2697_v18  ;;  %vm3004_vm15 = vmand %vm1032_vm9, %vm1044_vm11 }
  0xfa   : > { %v720_v23 = vsel %vm3880_vm12, %v546_v19, 0.0  ;;  %v705_v26 = vsel %vm657_vm4, %v508_v21, 0.0  ;;  %v548_v27 = vpop.f32.mrb[3].mxu1  ;;  %v2974_v28 = vadd.f32 %v719_v16, %v718_v10  ;;  %v1138_v24 = vmax.f32 %v2947_v11, -1e+30 }
  0xfb   : > { %v721_v30 = vsel %vm3879_vm3, %v548_v27, 0.0  ;;  %v1114_v31 = vmax.f32 %v2939_v6, -1e+30  ;;  %v2989_v33 = vadd.f32 %v705_v26, %v704_v17  ;;  %v2991_v34 = vsel %vm1052_vm2, %v506_v15, -1e+30  ;;  %v3107_v27 = vpop.permute.xlu0 %638 }
  0xfc   : > { %vm1016_vm4 = vcmp.ne.s32.totalorder %v992_v60, %v2878_v42  ;;  %v2996_v35 = vadd.f32 %v721_v30, %v720_v23  ;;  %1139 = vmax.xlane.f32.xlu1 %v1138_v24  ;;  %vm1020_vm2 = vcmp.ne.s32.totalorder %v2929_v3, %v2878_v42  ;;  %v3020_v45 = vsel %vm2980_vm13, %v546_v19, -1e+30 }
  0xfd   : > { %1115 = vmax.xlane.f32.xlu0 %v1114_v31  ;;  %vm1036_vm9 = vcmp.ne.s32.totalorder %v2926_v1, %v2878_v42  ;;  %vm3885_vm3 = vcmp.eq.s32.totalorder %v2998_v36, %v2695_v2  ;;  %v1117_v52 = vmax.f32 %v2991_v34, -1e+30  ;;  %vm3038_vm13 = vmand %vm1016_vm4, %vm1044_vm11  ;;  %vm3884_vm12 = vcmp.eq.s32.totalorder %v2998_v36, %v2697_v18 }
  0xfe   : > { %v512_v46 = vpop.f32.mrb[4].mxu0  ;;  %vm3883_vm1 = vcmp.eq.s32.totalorder %v3016_v44, %v2695_v2  ;;  %v1141_v17 = vmax.f32 %v3020_v45, -1e+30  ;;  %v3099_v23 = vadd.s32 %v2870_v38, %v986_v43  ;;  %vm662_vm4 = vcmp.eq.s32.totalorder %v2868_v37, %v2695_v2 }
  0xff   : > { %v552_v51 = vpop.f32.mrb[4].mxu1  ;;  %v706_v53 = vsel %vm658_vm5, %v512_v46, 0.0  ;;  %v514_v55 = vpop.f32.mrb[5].mxu0  ;;  %vm3882_vm5 = vcmp.eq.s32.totalorder %v3016_v44, %v2697_v18  ;;  %v3068_v25 = vsel %vm3038_vm13, %v512_v46, -1e+30  ;;  %v1004_v30 = vadd.s32 %v2870_v38, %v987_v49 }
 0x100   : > { %v722_v56 = vsel %vm3885_vm3, %v552_v51, 0.0  ;;  %v3051_v57 = vsel %vm3004_vm15, %v552_v51, -1e+30  ;;  %v707_v59 = vsel %vm659_vm6, %v514_v55, 0.0  ;;  %v554_v60 = vpop.f32.mrb[5].mxu1  ;;  %v516_v63 = vpop.f32.mrb[6].mxu0  ;;  %1118 = vmax.xlane.f32.xlu1 %v1117_v52  ;;  %vm3092_vm6 = vmand %vm1018_vm14, %vm1044_vm11  ;;  %vm664_vm15 = vcmp.eq.s32.totalorder %v2872_v39, %v2695_v2 }
 0x101   : > { %735 = vadd.xlane.f32.xlu0 %v734_v22  ;;  %v723_v4 = vsel %vm3884_vm12, %v554_v60, 0.0  ;;  %v708_v5 = vsel %vm660_vm7, %v516_v63, 0.0  ;;  %v556_v7 = vpop.f32.mrb[6].mxu1  ;;  %v518_v8 = vpop.f32.mrb[7].mxu0  ;;  %v3064_v9 = vadd.f32 %v707_v59, %v706_v53  ;;  %v1144_v19 = vmax.f32 %v3051_v57, -1e+30  ;;  %vm3115_vm14 = vmand %vm1020_vm2, %vm1044_vm11 }
 0x102   : > { %v724_v10 = vsel %vm3883_vm1, %v556_v7, 0.0  ;;  %v709_v12 = vsel %vm661_vm8, %v518_v8, 0.0  ;;  %v558_v13 = vpop.f32.mrb[7].mxu1  ;;  %v3076_v15 = vadd.f32 %v723_v4, %v722_v56  ;;  %v3085_v22 = vpop.permute.xlu1 %635  ;;  %vm1022_vm7 = vcmp.ne.s32.totalorder %v3013_v41, %v2878_v42 }
 0x103   : > { %v725_v16 = vsel %vm3882_vm5, %v558_v13, 0.0  ;;  %v3083_v21 = vadd.f32 %v709_v12, %v708_v5  ;;  %vm1024_vm8 = vcmp.ne.s32.totalorder %v3026_v50, %v2878_v42  ;;  %v1120_v61 = vmax.f32 %v3068_v25, -1e+30  ;;  %vm3130_vm5 = vmand %vm1034_vm0, %vm1044_vm11  ;;  %v3201_v32 = vpop.permute.xlu0 %641 }
 0x104   : > { %v3103_v26 = vadd.f32 %v725_v16, %v724_v10  ;;  %1145 = vmax.xlane.f32.xlu1 %v1144_v19  ;;  %v980_v24 = vadd.s32 56, %v2688_v14  ;;  %vm3887_vm13 = vcmp.eq.s32.totalorder %v3107_v27, %v2695_v2  ;;  %vm663_vm2 = vcmp.eq.s32.totalorder %v2868_v37, %v2697_v18  ;;  %vm3149_vm0 = vmand %vm1036_vm9, %vm1044_vm11 }
 0x105   : > { %1142 = vmax.xlane.f32.xlu0 %v1141_v17  ;;  %vm3888_vm1 = vcmp.eq.s32.totalorder %v2872_v39, %v2697_v18  ;;  %vm678_vm12 = vcmp.eq.s32.totalorder %v3085_v22, %v2695_v2  ;;  %v3142_v40 = vsel %vm3092_vm6, %v516_v63, -1e+30  ;;  %vm3886_vm3 = vcmp.eq.s32.totalorder %v3107_v27, %v2697_v18  ;;  %vm3209_vm6 = vmand %vm1024_vm8, %vm1044_vm11 }
 0x106   : > { %v522_v31 = vpop.f32.mrb[8].mxu0  ;;  %vm679_vm9 = vcmp.eq.s32.totalorder %v3085_v22, %v2697_v18  ;;  %v3172_v55 = vsel %vm3130_vm5, %v556_v7, -1e+30  ;;  %v1123_v16 = vmax.f32 %v3142_v40, -1e+30  ;;  %vm1040_vm5 = vcmp.ne.s32.totalorder %v1004_v30, %v2878_v42 }
 0x107   : > { %v562_v43 = vpop.f32.mrb[8].mxu1  ;;  %v710_v46 = vsel %vm662_vm4, %v522_v31, 0.0  ;;  %v524_v49 = vpop.f32.mrb[9].mxu0  ;;  %v3163_v52 = vsel %vm3115_vm14, %v522_v31, -1e+30  ;;  %vm3220_vm14 = vmand %vm1022_vm7, %vm1044_vm11  ;;  %v997_v31 = vadd.s32 %v2870_v38, %v980_v24  ;;  %vm666_vm8 = vcmp.eq.s32.totalorder %v2884_v47, %v2695_v2 }
 0x108   : > { %v726_v51 = vsel %vm678_vm12, %v562_v43, 0.0  ;;  %v711_v1 = vsel %vm663_vm2, %v524_v49, 0.0  ;;  %v564_v53 = vpop.f32.mrb[9].mxu1  ;;  %v526_v54 = vpop.f32.mrb[10].mxu0  ;;  %v3184_v5 = vsel %vm3149_vm0, %v562_v43, -1e+30  ;;  %vm1038_vm0 = vcmp.ne.s32.totalorder %v3099_v23, %v2878_v42 }
 0x109   : > { %1121 = vmax.xlane.f32.xlu0 %v1120_v61  ;;  %v727_v56 = vsel %vm679_vm9, %v564_v53, 0.0  ;;  %v712_v59 = vsel %vm664_vm15, %v526_v54, 0.0  ;;  %v566_v60 = vpop.f32.mrb[10].mxu1  ;;  %v528_v63 = vpop.f32.mrb[11].mxu0  ;;  %v3180_v4 = vadd.f32 %v711_v1, %v710_v46  ;;  %v1126_v17 = vmax.f32 %v3163_v52, -1e+30 }
 0x10a   : > { %v728_v7 = vsel %vm3887_vm13, %v566_v60, 0.0  ;;  %v713_v8 = vsel %vm3888_vm1, %v528_v63, 0.0  ;;  %v568_v10 = vpop.f32.mrb[11].mxu1  ;;  %v3192_v12 = vadd.f32 %v727_v56, %v726_v51  ;;  %v1150_v50 = vmax.f32 %v3184_v5, -1e+30  ;;  %vm3242_vm1 = vmand %vm1040_vm5, %vm1044_vm11 }
 0x10b   : > { %v729_v13 = vsel %vm3886_vm3, %v568_v10, 0.0  ;;  %v3199_v19 = vadd.f32 %v713_v8, %v712_v59  ;;  %1127 = vmax.xlane.f32.xlu1 %v1126_v17  ;;  %v1147_v43 = vmax.f32 %v3172_v55, -1e+30  ;;  %vm667_vm7 = vcmp.eq.s32.totalorder %v2884_v47, %v2697_v18 }
 0x10c   : > { %v3213_v29 = vadd.f32 %v729_v13, %v728_v7  ;;  %v988_v41 = vadd.s32 120, %v2688_v14  ;;  %vm668_vm3 = vcmp.eq.s32.totalorder %v2886_v48, %v2695_v2  ;;  %vm682_vm13 = vcmp.eq.s32.totalorder %v3201_v32, %v2695_v2 }
 0x10d   : > { %1124 = vmax.xlane.f32.xlu0 %v1123_v16  ;;  %v3255_v1 = vsel %vm3220_vm14, %v526_v54, -1e+30  ;;  %vm683_vm5 = vcmp.eq.s32.totalorder %v3201_v32, %v2697_v18  ;;  %vm669_vm14 = vcmp.eq.s32.totalorder %v2886_v48, %v2697_v18 }
 0x10e   : > { %v532_v0 = vpop.f32.mrb[12].mxu0  ;;  %v1005_v24 = vadd.s32 %v2870_v38, %v988_v41 }
 0x10f   : > { %v572_v46 = vpop.f32.mrb[12].mxu1  ;;  %v714_v49 = vsel %vm666_vm8, %v532_v0, 0.0  ;;  %v3251_v14 = vsel %vm3209_vm6, %v532_v0, -1e+30  ;;  %v534_v51 = vpop.f32.mrb[13].mxu0  ;;  %vm3270_vm6 = vmand %vm1038_vm0, %vm1044_vm11  ;;  %1151 = vmax.xlane.f32.xlu1 %v1150_v50 }
 0x110   : > { %v730_v30 = vsel %vm682_vm13, %v572_v46, 0.0  ;;  %v715_v53 = vsel %vm667_vm7, %v534_v51, 0.0  ;;  %v574_v56 = vpop.f32.mrb[13].mxu1  ;;  %v536_v59 = vpop.f32.mrb[14].mxu0  ;;  %v3288_v13 = vsel %vm3242_vm1, %v572_v46, -1e+30  ;;  %vm1026_vm1 = vcmp.ne.s32.totalorder %v997_v31, %v2878_v42 }
 0x111   : > { %1148 = vmax.xlane.f32.xlu0 %v1147_v43  ;;  %v731_v63 = vsel %vm683_vm5, %v574_v56, 0.0  ;;  %v716_v7 = vsel %vm668_vm3, %v536_v59, 0.0  ;;  %v538_v8 = vpop.f32.mrb[15].mxu0  ;;  %v3282_v10 = vpop.f32.mrb[14].mxu1  ;;  %v3284_v23 = vadd.f32 %v715_v53, %v714_v49  ;;  %v1132_v17 = vmax.f32 %v3251_v14, -1e+30  ;;  %vm1064_vm0 = vmand %vm1026_vm1, %vm1044_vm11 }
 0x112   : > { %v717_v16 = vsel %vm669_vm14, %v538_v8, 0.0  ;;  %v3294_v61 = vpop.f32.mrb[15].mxu1  ;;  %v3296_v3 = vadd.f32 %v731_v63, %v730_v30  ;;  %v1129_v50 = vmax.f32 %v3255_v1, -1e+30  ;;  %v3303_v0 = vsel %vm3270_vm6, %v566_v60, -1e+30 }
 0x113   : > { %v3299_v43 = vadd.f32 %v717_v16, %v716_v7  ;;  %1133 = vmax.xlane.f32.xlu1 %v1132_v17  ;;  %v1156_v46 = vmax.f32 %v3288_v13, -1e+30  ;;  %v1153_v49 = vmax.f32 %v3303_v0, -1e+30  ;;  %v839_v51 = vsel %vm662_vm4, 1.0, %v3889_v20  ;;  %v815_v53 = vld [vmem:[#allocation5] sm:$0xff] }
 0x114   : > { %v840_v60 = vsel %vm663_vm2, 1.0, %v3889_v20  ;;  %vm1042_vm6 = vcmp.ne.s32.totalorder %v1005_v24, %v2878_v42  ;;  %v3320_v31 = vsel %vm1064_vm0, %v536_v59, -1e+30  ;;  %v596_v56 = vld [vmem:[%s2648_s9 + $0x78] sm:$0xff]  ;;  %v816_v59 = vld [vmem:[#allocation5 + $0x8] sm:$0xff]  ;;  %v817_v7 = vld [vmem:[#allocation5 + $0x10] sm:$0xff] }
 0x115   : > { %1130 = vmax.xlane.f32.xlu0 %v1129_v50  ;;  %v875_v38 = vadd.f32 %v840_v60, %v839_v51  ;;  %vm1080_vm4 = vmand %vm1042_vm6, %vm1044_vm11  ;;  %v1135_v41 = vmax.f32 %v3320_v31, -1e+30  ;;  %vm3937_vm2 = vcmask 7168   ;;  %v818_v50 = vld [vmem:[#allocation5 + $0x18] sm:$0xff]  ;;  %v3336_v51 = vld [vmem:[#allocation2] sm:$0xff] }
 0x116   : > { %v3326_v37 = vsel %vm1080_vm4, %v3282_v10, -1e+30  ;;  %vm3938_vm11 = vmmov %vm3937_vm2  ;;  %v3404_v20 = vld [vmem:[#allocation2 + $0x58] sm:$0xff] }
 0x117   : > { %1157 = vmax.xlane.f32.xlu1 %v1156_v46  ;;  %v1159_v30 = vmax.f32 %v3326_v37, -1e+30  ;;  %vm3939_vm1 = vmmov %vm3937_vm2  ;;  %3956 = vst [vmem:[#allocation16_spill] sm:$0xff] %v3404_v20 }
 0x118   : > { %vm3940_vm0 = vmmov %vm3939_vm1 }
 0x119   : > { %1154 = vmax.xlane.f32.xlu0 %v1153_v49  ;;  %v3334_v49 = vld [vmem:[#allocation2 + $0x40] sm:$0xff]  ;;  %vm3941_vm6 = vmmov %vm3940_vm0 }
 0x11a   : > { %vm3942_vm4 = vmmov %vm3940_vm0 }
 0x11d   : > { %876 = vadd.xlane.f32.xlu0 %v875_v38 }
 0x121   : > { %1136 = vmax.xlane.f32.xlu0 %v1135_v41 }
 0x125   : > { %1160 = vmax.xlane.f32.xlu0 %v1159_v30 }
 0x128   : > { %v865_v54 = vpop.xlane.xlu0 %864  ;;  %644 = vperm.xlu1 %2380, %v596_v56   ;;  %v3344_v56 = vld [vmem:[#allocation2 + $0x8] sm:$0xff] }
 0x129   : > { %v911_v63 = vadd.f32 %v865_v54, %v815_v53  ;;  %v686_v53 = vld [vmem:[#allocation4] sm:$0xff] }
 0x12b   : > { %927 = vst.msk [vmem:[#allocation5] sm:$0xff] %vm3937_vm2, %v911_v63  ;;  %vm3944_vm2 = vmmov %vm3940_vm0 }
 0x12c   : > { %v868_v42 = vpop.xlane.xlu1 %867  ;;  %v871_v8 = vpop.xlane.xlu0 %870 }
 0x12d   : > { %v912_v16 = vadd.f32 %v868_v42, %v816_v59  ;;  %v913_v17 = vadd.f32 %v871_v8, %v817_v7 }
 0x12f   : > { %928 = vst.msk [vmem:[#allocation5 + $0x8] sm:$0xff] %vm3938_vm11, %v912_v16  ;;  %v3359_v16 = vld [vmem:[#allocation2 + $0x48] sm:$0xff]  ;;  %vm3945_vm11 = vmmov %vm3940_vm0 }
 0x130   : > { %929 = vst.msk [vmem:[#allocation5 + $0x10] sm:$0xff] %vm3939_vm1, %v913_v17  ;;  %v874_v46 = vpop.xlane.xlu1 %873  ;;  %v3361_v17 = vld [vmem:[#allocation2 + $0x50] sm:$0xff]  ;;  %vm3949_vm1 = vmmov %vm3940_vm0 }
 0x131   : > { %v914_v24 = vadd.f32 %v874_v46, %v818_v50  ;;  %3943 = vst [vmem:[#allocation7_spill] sm:$0xff] %v3361_v17  ;;  %v3391_v50 = vld [vmem:[#allocation2 + $0x20] sm:$0xff] }
 0x132   : > { %3952 = vst [vmem:[#allocation13_spill] sm:$0xff] %v3391_v50 }
 0x133   : > { %930 = vst.msk [vmem:[#allocation5 + $0x18] sm:$0xff] %vm3940_vm0, %v914_v24 }
 0x189   : > { %v1140_v60 = vpop.xlane.xlu1 %1139 }
 0x18a   : > { %v1116_v38 = vpop.xlane.xlu0 %1115  ;;  %v3339_v41 = vmax.f32 %v3334_v49, %v1140_v60 }
 0x18b   : > { %v3342_v30 = vmax.f32 %v3336_v51, %v1116_v38 }
 0x18c   : > { %1522 = vst.msk [vmem:[#allocation2 + $0x40] sm:$0xff] %vm3941_vm6, %v3339_v41  ;;  %1220 = vperm.xlu0 %2379, %v3339_v41   ;;  %vm3953_vm6 = vmmov %vm3940_vm0 }
 0x18d   : > { %1514 = vst.msk [vmem:[#allocation2] sm:$0xff] %vm3942_vm4, %v3342_v30  ;;  %1180 = vperm.xlu1 %2380, %v3342_v30   ;;  %v1119_v7 = vpop.xlane.xlu1 %1118  ;;  %vm3958_vm4 = vmmov %vm3940_vm0 }
 0x18e   : > { %v736_v59 = vpop.xlane.xlu0 %735  ;;  %v3357_v8 = vmax.f32 %v3344_v56, %v1119_v7 }
 0x18f   : > { %v782_v42 = vadd.f32 %v736_v59, %v686_v53  ;;  %v3375_v53 = vld [vmem:[#allocation2 + $0x10] sm:$0xff] }
 0x190   : > { %1515 = vst.msk [vmem:[#allocation2 + $0x8] sm:$0xff] %vm3945_vm11, %v3357_v8  ;;  %3948 = vst [vmem:[#allocation10_spill] sm:$0xff] %v3375_v53 }
 0x191   : > { %799 = vst.msk [vmem:[#allocation4] sm:$0xff] %vm3944_vm2, %v782_v42  ;;  %1185 = vperm.xlu1 %2380, %v3357_v8   ;;  %v1146_v24 = vpop.xlane.xlu1 %1145  ;;  %vm3959_vm2 = vmmov %vm3940_vm0 }
 0x192   : > { %v1143_v46 = vpop.xlane.xlu0 %1142  ;;  %v3373_v38 = vmax.f32 %v3361_v17, %v1146_v24  ;;  %v3389_v24 = vld [vmem:[#allocation2 + $0x18] sm:$0xff]  ;;  %v3406_v17 = vld [vmem:[#allocation2 + $0x60] sm:$0xff]  ;;  %vm3963_vm11 = vmmov %vm3940_vm0 }
 0x193   : > { %v3370_v60 = vmax.f32 %v3359_v16, %v1143_v46  ;;  %3951 = vst [vmem:[#allocation12_spill] sm:$0xff] %v3389_v24  ;;  %3957 = vst [vmem:[#allocation17_spill] sm:$0xff] %v3406_v17 }
 0x194   : > { %3947 = vst [vmem:[#allocation9_spill] sm:$0xff] %v3373_v38  ;;  %1524 = vst.msk [vmem:[#allocation2 + $0x50] sm:$0xff] %vm3940_vm0, %v3373_v38 }
 0x195   : > { %3946 = vst [vmem:[#allocation8_spill] sm:$0xff] %v3370_v60  ;;  %1523 = vst.msk [vmem:[#allocation2 + $0x48] sm:$0xff] %vm3949_vm1, %v3370_v60  ;;  %1225 = vperm.xlu1 %2380, %v3370_v60   ;;  %v3426_v60 = vld [vmem:[#allocation2 + $0x30] sm:$0xff] }
 0x196   : > { %v1122_v42 = vpop.xlane.xlu0 %1121  ;;  %3962 = vst [vmem:[#allocation20_spill] sm:$0xff] %v3426_v60  ;;  %vm3964_vm1 = vmmov %vm3940_vm0 }
 0x197   : > { %v3387_v46 = vmax.f32 %v3375_v53, %v1122_v42 }
 0x198   : > { %v1128_v54 = vpop.xlane.xlu1 %1127 }
 0x199   : > { %3950 = vst [vmem:[#allocation11_spill] sm:$0xff] %v3387_v46  ;;  %1516 = vst.msk [vmem:[#allocation2 + $0x10] sm:$0xff] %vm3953_vm6, %v3387_v46  ;;  %1190 = vperm.xlu0 %2379, %v3387_v46   ;;  %v3402_v42 = vmax.f32 %v3391_v50, %v1128_v54 }
 0x19a   : > { %v1125_v7 = vpop.xlane.xlu0 %1124  ;;  %vm3967_vm6 = vmmov %vm3940_vm0 }
 0x19b   : > { %v3399_v63 = vmax.f32 %v3389_v24, %v1125_v7  ;;  %3955 = vst [vmem:[#allocation15_spill] sm:$0xff] %v3402_v42  ;;  %1518 = vst.msk [vmem:[#allocation2 + $0x20] sm:$0xff] %vm3959_vm2, %v3402_v42  ;;  %v3424_v24 = vld [vmem:[#allocation2 + $0x28] sm:$0xff] }
 0x19c   : > { %v1152_v7 = vpop.xlane.xlu1 %1151  ;;  %3961 = vst [vmem:[#allocation19_spill] sm:$0xff] %v3424_v24  ;;  %vm3971_vm2 = vmmov %vm3940_vm0 }
 0x19d   : > { %3954 = vst [vmem:[#allocation14_spill] sm:$0xff] %v3399_v63  ;;  %1517 = vst.msk [vmem:[#allocation2 + $0x18] sm:$0xff] %vm3958_vm4, %v3399_v63  ;;  %1195 = vperm.xlu1 %2380, %v3399_v63   ;;  %1230 = vperm.xlu0 %2379, %v3373_v38   ;;  %v3422_v59 = vmax.f32 %v3406_v17, %v1152_v7  ;;  %v3446_v63 = vld [vmem:[#allocation2 + $0x70] sm:$0xff] }
 0x19e   : > { %v1149_v54 = vpop.xlane.xlu0 %1148  ;;  %3966 = vst [vmem:[#allocation22_spill] sm:$0xff] %v3446_v63  ;;  %vm3970_vm4 = vmmov %vm3940_vm0 }
 0x19f   : > { %v3419_v53 = vmax.f32 %v3404_v20, %v1149_v54  ;;  %1526 = vst.msk [vmem:[#allocation2 + $0x60] sm:$0xff] %vm3964_vm1, %v3422_v59  ;;  %v3444_v20 = vld [vmem:[#allocation2 + $0x68] sm:$0xff] }
 0x1a0   : > { %v1134_v7 = vpop.xlane.xlu1 %1133 }
 0x1a1   : > { %3960 = vst [vmem:[#allocation18_spill] sm:$0xff] %v3419_v53  ;;  %1525 = vst.msk [vmem:[#allocation2 + $0x58] sm:$0xff] %vm3963_vm11, %v3419_v53  ;;  %1235 = vperm.xlu1 %2380, %v3419_v53   ;;  %1200 = vperm.xlu0 %2379, %v3402_v42   ;;  %v3442_v46 = vmax.f32 %v3426_v60, %v1134_v7  ;;  %v3480_v53 = vld [vmem:[#allocation2 + $0x38] sm:$0xff] }
 0x1a2   : > { %v1131_v54 = vpop.xlane.xlu0 %1130 }
 0x1a3   : > { %v3439_v38 = vmax.f32 %v3424_v24, %v1131_v54  ;;  %3965 = vst [vmem:[#allocation21_spill] sm:$0xff] %v3442_v46  ;;  %1520 = vst.msk [vmem:[#allocation2 + $0x30] sm:$0xff] %vm3967_vm6, %v3442_v46  ;;  %v819_v24 = vld [vmem:[#allocation5 + $0x20] sm:$0xff] }
 0x1a4   : > { %v1158_v7 = vpop.xlane.xlu1 %1157  ;;  %vm3973_vm6 = vmmov %vm3940_vm0 }
 0x1a5   : > { %1519 = vst.msk [vmem:[#allocation2 + $0x28] sm:$0xff] %vm3940_vm0, %v3439_v38  ;;  %1205 = vperm.xlu1 %2380, %v3439_v38   ;;  %1240 = vperm.xlu0 %2379, %v3422_v59   ;;  %v3462_v50 = vmax.f32 %v3446_v63, %v1158_v7 }
 0x1a6   : > { %v1155_v54 = vpop.xlane.xlu0 %1154 }
 0x1a7   : > { %v3459_v42 = vmax.f32 %v3444_v20, %v1155_v54  ;;  %3969 = vst [vmem:[#allocation24_spill] sm:$0xff] %v3462_v50  ;;  %1528 = vst.msk [vmem:[#allocation2 + $0x70] sm:$0xff] %vm3971_vm2, %v3462_v50  ;;  %vm3977_vm2 = vcmp.eq.s32.totalorder %v2906_v58, %v2697_v18 }
 0x1a8   : > { %v3474_v7 = vpop.permute.xlu1 %644 }
 0x1a9   : > { %3968 = vst [vmem:[#allocation23_spill] sm:$0xff] %v3459_v42  ;;  %1527 = vst.msk [vmem:[#allocation2 + $0x68] sm:$0xff] %vm3970_vm4, %v3459_v42  ;;  %1245 = vperm.xlu1 %2380, %v3459_v42   ;;  %1210 = vperm.xlu0 %2379, %v3442_v46   ;;  %vm684_vm11 = vcmp.eq.s32.totalorder %v3474_v7, %v2695_v2  ;;  %vm685_vm1 = vcmp.eq.s32.totalorder %v3474_v7, %v2697_v18  ;;  %v3497_v42 = vld [vmem:[#allocation2 + $0x78] sm:$0xff] }
 0x1aa   : > { %v877_v54 = vpop.xlane.xlu0 %876  ;;  %v732_v17 = vsel %vm684_vm11, %v3282_v10, 0.0  ;;  %3972 = vst [vmem:[#allocation25_spill] sm:$0xff] %v3497_v42  ;;  %vm3975_vm4 = vmmov %vm3940_vm0 }
 0x1ab   : > { %v915_v60 = vadd.f32 %v877_v54, %v819_v24  ;;  %v733_v24 = vsel %vm685_vm1, %v3294_v61, 0.0 }
 0x1ac   : > { %v3492_v63 = vadd.f32 %v733_v24, %v732_v17  ;;  %v3976_v17 = vmov 0.0  }
 0x1ad   : > { %931 = vst.msk [vmem:[#allocation5 + $0x20] sm:$0xff] %vm3940_vm0, %v915_v60  ;;  %1250 = vperm.xlu0 %2379, %v3462_v50   ;;  %v843_v24 = vsel %vm666_vm8, 1.0, %v3976_v17  ;;  %v847_v61 = vsel %vm670_vm10, 1.0, %v3976_v17  ;;  %v848_v10 = vsel %vm3977_vm2, 1.0, %v3976_v17  ;;  %vm3978_vm8 = vcmp.eq.s32.totalorder %v2998_v36, %v2695_v2  ;;  %vm3992_vm2 = vmmov %vm3940_vm0 }
 0x1ae   : > { %v1137_v54 = vpop.xlane.xlu0 %1136  ;;  %v855_v58 = vsel %vm678_vm12, 1.0, %v3976_v17  ;;  %vm3980_vm10 = vcmp.eq.s32.totalorder %v2872_v39, %v2697_v18  ;;  %v860_v22 = vsel %vm683_vm5, 1.0, %v3976_v17  ;;  %v846_v39 = vsel %vm669_vm14, 1.0, %v3976_v17  ;;  %vm3987_vm14 = vmmov %vm3940_vm0 }
 0x1af   : > { %v3495_v46 = vmax.f32 %v3480_v53, %v1137_v54  ;;  %v844_v54 = vsel %vm667_vm7, 1.0, %v3976_v17  ;;  %vm3979_vm7 = vcmp.eq.s32.totalorder %v2998_v36, %v2697_v18  ;;  %v842_v36 = vsel %vm3980_vm10, 1.0, %v3976_v17  ;;  %vm3995_vm10 = vmmov %vm3940_vm0 }
 0x1b0   : > { %v852_v47 = vsel %vm3979_vm7, 1.0, %v3976_v17  ;;  %vm3981_vm12 = vcmp.eq.s32.totalorder %v2920_v62, %v2695_v2  ;;  %vm3986_vm5 = vcmp.eq.s32.totalorder %v3107_v27, %v2697_v18  ;;  %vm3994_vm7 = vmmov %vm3940_vm0 }
 0x1b1   : > { %1521 = vst.msk [vmem:[#allocation2 + $0x38] sm:$0xff] %vm3973_vm6, %v3495_v46  ;;  %1215 = vperm.xlu1 %2380, %v3495_v46   ;;  %v849_v32 = vsel %vm3981_vm12, 1.0, %v3976_v17  ;;  %vm3990_vm6 = vmmov %vm3940_vm0 }
 0x1b2   : > { %v1161_v60 = vpop.xlane.xlu0 %1160  ;;  %vm3996_vm12 = vmmov %vm3940_vm0 }
 0x1b3   : > { %v3505_v50 = vmax.f32 %v3497_v42, %v1161_v60  ;;  %v881_v60 = vadd.f32 %v844_v54, %v843_v24  ;;  %v851_v42 = vsel %vm3978_vm8, 1.0, %v3976_v17  ;;  %v859_v54 = vsel %vm682_vm13, 1.0, %v3976_v17  ;;  %vm3993_vm8 = vmmov %vm3940_vm0 }
 0x1b4   : > { %v893_v24 = vadd.f32 %v852_v47, %v851_v42  ;;  %v905_v47 = vadd.f32 %v860_v22, %v859_v54  ;;  %vm3984_vm13 = vcmp.eq.s32.totalorder %v3016_v44, %v2697_v18 }
 0x1b5   : > { %3974 = vst [vmem:[#allocation26_spill] sm:$0xff] %v3505_v50  ;;  %1529 = vst.msk [vmem:[#allocation2 + $0x78] sm:$0xff] %vm3975_vm4, %v3505_v50  ;;  %1255 = vperm.xlu1 %2380, %v3505_v50   ;;  %v887_v50 = vadd.f32 %v848_v10, %v847_v61  ;;  %v856_v10 = vsel %vm679_vm9, 1.0, %v3976_v17  ;;  %v841_v61 = vsel %vm664_vm15, 1.0, %v3976_v17  ;;  %vm3982_vm15 = vcmp.eq.s32.totalorder %v2920_v62, %v2697_v18 }
 0x1b6   : > { %v878_v42 = vadd.f32 %v842_v36, %v841_v61  ;;  %v854_v61 = vsel %vm3984_vm13, 1.0, %v3976_v17  ;;  %vm3985_vm9 = vcmp.eq.s32.totalorder %v3107_v27, %v2695_v2  ;;  %vm3991_vm4 = vmmov %vm3940_vm0 }
 0x1b7   : > { %v857_v62 = vsel %vm3985_vm9, 1.0, %v3976_v17  ;;  %vm3999_vm13 = vmmov %vm3940_vm0 }
 0x1b8   : > { %vm4000_vm9 = vmmov %vm3940_vm0 }
 0x1cc   : > { %882 = vadd.xlane.f32.xlu0 %v881_v60  ;;  %v845_v60 = vsel %vm668_vm3, 1.0, %v3976_v17  ;;  %vm3983_vm3 = vcmp.eq.s32.totalorder %v3016_v44, %v2695_v2  ;;  %v861_v44 = vsel %vm684_vm11, 1.0, %v3976_v17  ;;  %vm3988_vm11 = vmmov %vm3940_vm0 }
 0x1cd   : > { %v853_v48 = vsel %vm3983_vm3, 1.0, %v3976_v17  ;;  %vm3998_vm3 = vmmov %vm3940_vm0 }
 0x1ce   : > { %v896_v36 = vadd.f32 %v854_v61, %v853_v48 }
 0x1d0   : > { %888 = vadd.xlane.f32.xlu0 %v887_v50  ;;  %v899_v50 = vadd.f32 %v856_v10, %v855_v58  ;;  %v850_v58 = vsel %vm3982_vm15, 1.0, %v3976_v17  ;;  %vm3997_vm15 = vmmov %vm3940_vm0 }
 0x1d1   : > { %v890_v10 = vadd.f32 %v850_v58, %v849_v32 }
 0x1d4   : > { %894 = vadd.xlane.f32.xlu0 %v893_v24  ;;  %v884_v24 = vadd.f32 %v846_v39, %v845_v60 }
 0x1d8   : > { %900 = vadd.xlane.f32.xlu0 %v899_v50 }
 0x1d9   : > { %879 = vadd.xlane.f32.xlu1 %v878_v42 }
 0x1dc   : > { %906 = vadd.xlane.f32.xlu0 %v905_v47 }
 0x1dd   : > { %885 = vadd.xlane.f32.xlu1 %v884_v24 }
 0x1e0   : > { %738 = vadd.xlane.f32.xlu0 %v2989_v33  ;;  %v858_v33 = vsel %vm3986_vm5, 1.0, %v3976_v17  ;;  %vm4001_vm5 = vmmov %vm3940_vm0 }
 0x1e1   : > { %891 = vadd.xlane.f32.xlu1 %v890_v10  ;;  %v902_v50 = vadd.f32 %v858_v33, %v857_v62 }
 0x1e4   : > { %744 = vadd.xlane.f32.xlu0 %v3083_v21  ;;  %v862_v21 = vsel %vm685_vm1, 1.0, %v3976_v17  ;;  %vm3989_vm1 = vmmov %vm3940_vm0 }
 0x1e5   : > { %897 = vadd.xlane.f32.xlu1 %v896_v36  ;;  %v908_v42 = vadd.f32 %v862_v21, %v861_v44 }
 0x1e8   : > { %750 = vadd.xlane.f32.xlu0 %v3199_v19 }
 0x1e9   : > { %903 = vadd.xlane.f32.xlu1 %v902_v50 }
 0x1ec   : > { %756 = vadd.xlane.f32.xlu0 %v3299_v43 }
 0x1ed   : > { %909 = vadd.xlane.f32.xlu1 %v908_v42 }
 0x1f1   : > { %741 = vadd.xlane.f32.xlu1 %v3064_v9 }
 0x1f5   : > { %747 = vadd.xlane.f32.xlu1 %v3180_v4 }
 0x1f9   : > { %753 = vadd.xlane.f32.xlu1 %v3284_v23 }
 0x20b   : > { %v1221_v19 = vpop.permute.xlu0 %1220 }
 0x20c   : > { %v1181_v27 = vpop.permute.xlu1 %1180  ;;  %v1274_v22 = vsub.f32 %v2947_v11, %v1221_v19  ;;  %v1275_v18 = vsub.f32 -1e+30, %v1221_v19 }
 0x20d   : > { %v1258_v2 = vsub.f32 %v2939_v6, %v1181_v27  ;;  %v1259_v54 = vsub.f32 -1e+30, %v1181_v27 }
 0x20e   : > { %v1322_v60 = vmul.f32 1.442695, %v1274_v22  ;;  %v1324_v39 = vmul.f32 1.442695, %v1275_v18 }
 0x20f   : > { %v1290_v7 = vmul.f32 1.442695, %v1258_v2  ;;  %v1292_v17 = vmul.f32 1.442695, %v1259_v54 }
 0x210   : > { %v1186_v43 = vpop.permute.xlu1 %1185 }
 0x211   : > { %2387 = vpow2.f32 %v1290_v7  ;;  %v1260_v9 = vsub.f32 %v2991_v34, %v1186_v43  ;;  %v1261_v47 = vsub.f32 -1e+30, %v1186_v43 }
 0x212   : > { %2389 = vpow2.f32 %v1292_v17 }
 0x213   : > { %2391 = vpow2.f32 %v1322_v60  ;;  %v1294_v4 = vmul.f32 1.442695, %v1260_v9  ;;  %v1296_v23 = vmul.f32 1.442695, %v1261_v47 }
 0x214   : > { %2393 = vpow2.f32 %v1324_v39  ;;  %v1226_v24 = vpop.permute.xlu1 %1225 }
 0x215   : > { %2395 = vpow2.f32 %v1294_v4  ;;  %v1276_v6 = vsub.f32 %v3020_v45, %v1226_v24  ;;  %v1277_v11 = vsub.f32 -1e+30, %v1226_v24 }
 0x216   : > { %2397 = vpow2.f32 %v1296_v23 }
 0x217   : > { %v1326_v32 = vmul.f32 1.442695, %v1276_v6  ;;  %v1328_v58 = vmul.f32 1.442695, %v1277_v11 }
 0x218   : > { %v1191_v10 = vpop.permute.xlu0 %1190 }
 0x219   : > { %2399 = vpow2.f32 %v1326_v32  ;;  %v1262_v48 = vsub.f32 %v3068_v25, %v1191_v10  ;;  %v1263_v61 = vsub.f32 -1e+30, %v1191_v10 }
 0x21a   : > { %2401 = vpow2.f32 %v1328_v58 }
 0x21b   : > { %v2388_v34 = vpop.eup %2387  ;;  %v1298_v36 = vmul.f32 1.442695, %v1262_v48  ;;  %v1300_v62 = vmul.f32 1.442695, %v1263_v61 }
 0x21c   : > { %v2390_v33 = vpop.eup %2389  ;;  %v1196_v50 = vpop.permute.xlu1 %1195 }
 0x21d   : > { %v1231_v44 = vpop.permute.xlu0 %1230  ;;  %v2392_v21 = vpop.eup %2391  ;;  %2403 = vpow2.f32 %v1298_v36  ;;  %v1264_v45 = vsub.f32 %v3142_v40, %v1196_v50  ;;  %v1265_v42 = vsub.f32 -1e+30, %v1196_v50  ;;  %v1354_v54 = vadd.f32 %v2390_v33, %v2388_v34 }
 0x21e   : > { %v1278_v27 = vsub.f32 %v3051_v57, %v1231_v44  ;;  %v2394_v19 = vpop.eup %2393  ;;  %2405 = vpow2.f32 %v1300_v62  ;;  %v1279_v2 = vsub.f32 -1e+30, %v1231_v44 }
 0x21f   : > { %v2396_v25 = vpop.eup %2395  ;;  %v1302_v22 = vmul.f32 1.442695, %v1264_v45  ;;  %v1304_v18 = vmul.f32 1.442695, %v1265_v42  ;;  %v1378_v17 = vadd.f32 %v2394_v19, %v2392_v21  ;;  %1355 = vadd.xlane.f32.xlu1 %v1354_v54 }
 0x220   : > { %v1330_v7 = vmul.f32 1.442695, %v1278_v27  ;;  %v2398_v60 = vpop.eup %2397  ;;  %v1332_v39 = vmul.f32 1.442695, %v1279_v2  ;;  %v1236_v43 = vpop.permute.xlu1 %1235 }
 0x221   : > { %v1201_v9 = vpop.permute.xlu0 %1200  ;;  %2407 = vpow2.f32 %v1302_v22  ;;  %1379 = vadd.xlane.f32.xlu0 %v1378_v17  ;;  %v1280_v40 = vsub.f32 %v3172_v55, %v1236_v43  ;;  %v1281_v47 = vsub.f32 -1e+30, %v1236_v43  ;;  %v1357_v23 = vadd.f32 %v2398_v60, %v2396_v25 }
 0x222   : > { %v1266_v57 = vsub.f32 %v3163_v52, %v1201_v9  ;;  %2409 = vpow2.f32 %v1304_v18  ;;  %v1267_v4 = vsub.f32 -1e+30, %v1201_v9 }
 0x223   : > { %v2400_v24 = vpop.eup %2399  ;;  %2411 = vpow2.f32 %v1330_v7  ;;  %v1334_v6 = vmul.f32 1.442695, %v1280_v40  ;;  %v1336_v11 = vmul.f32 1.442695, %v1281_v47 }
 0x224   : > { %v1306_v32 = vmul.f32 1.442695, %v1266_v57  ;;  %v2402_v58 = vpop.eup %2401  ;;  %2413 = vpow2.f32 %v1332_v39  ;;  %v1308_v10 = vmul.f32 1.442695, %v1267_v4  ;;  %v1206_v48 = vpop.permute.xlu1 %1205 }
 0x225   : > { %v1241_v61 = vpop.permute.xlu0 %1240  ;;  %2415 = vpow2.f32 %v1334_v6  ;;  %1358 = vadd.xlane.f32.xlu0 %v1357_v23  ;;  %v1268_v55 = vsub.f32 %v3255_v1, %v1206_v48  ;;  %v1269_v34 = vsub.f32 -1e+30, %v1206_v48  ;;  %v1381_v62 = vadd.f32 %v2402_v58, %v2400_v24 }
 0x226   : > { %v1282_v52 = vsub.f32 %v3184_v5, %v1241_v61  ;;  %2417 = vpow2.f32 %v1336_v11  ;;  %v1283_v36 = vsub.f32 -1e+30, %v1241_v61 }
 0x227   : > { %v2404_v33 = vpop.eup %2403  ;;  %2419 = vpow2.f32 %v1306_v32  ;;  %v1310_v50 = vmul.f32 1.442695, %v1268_v55  ;;  %v1312_v44 = vmul.f32 1.442695, %v1269_v34  ;;  %1382 = vadd.xlane.f32.xlu1 %v1381_v62 }
 0x228   : > { %v1338_v21 = vmul.f32 1.442695, %v1282_v52  ;;  %v2406_v45 = vpop.eup %2405  ;;  %2421 = vpow2.f32 %v1308_v10  ;;  %v1340_v42 = vmul.f32 1.442695, %v1283_v36  ;;  %v1246_v27 = vpop.permute.xlu1 %1245 }
 0x229   : > { %v1211_v19 = vpop.permute.xlu0 %1210  ;;  %2423 = vpow2.f32 %v1310_v50  ;;  %v1284_v1 = vsub.f32 %v3303_v0, %v1246_v27  ;;  %v1285_v2 = vsub.f32 -1e+30, %v1246_v27  ;;  %v1360_v25 = vadd.f32 %v2406_v45, %v2404_v33 }
 0x22a   : > { %v1270_v5 = vsub.f32 %v3251_v14, %v1211_v19  ;;  %2425 = vpow2.f32 %v1312_v44  ;;  %v1271_v54 = vsub.f32 -1e+30, %v1211_v19 }
 0x22b   : > { %v2408_v22 = vpop.eup %2407  ;;  %2427 = vpow2.f32 %v1338_v21  ;;  %v1342_v18 = vmul.f32 1.442695, %v1284_v1  ;;  %v1344_v7 = vmul.f32 1.442695, %v1285_v2  ;;  %1361 = vadd.xlane.f32.xlu0 %v1360_v25 }
 0x22c   : > { %v1314_v17 = vmul.f32 1.442695, %v1270_v5  ;;  %v2410_v60 = vpop.eup %2409  ;;  %2429 = vpow2.f32 %v1340_v42  ;;  %v1316_v39 = vmul.f32 1.442695, %v1271_v54 }
 0x22d   : > { %v1251_v43 = vpop.permute.xlu0 %1250  ;;  %v2412_v9 = vpop.eup %2411  ;;  %2431 = vpow2.f32 %v1342_v18  ;;  %v1363_v47 = vadd.f32 %v2410_v60, %v2408_v22 }
 0x22e   : > { %v1286_v0 = vsub.f32 %v3288_v13, %v1251_v43  ;;  %v1287_v40 = vsub.f32 -1e+30, %v1251_v43  ;;  %v2414_v14 = vpop.eup %2413  ;;  %2433 = vpow2.f32 %v1344_v7 }
 0x22f   : > { %v2416_v57 = vpop.eup %2415  ;;  %2435 = vpow2.f32 %v1314_v17  ;;  %1364 = vadd.xlane.f32.xlu1 %v1363_v47  ;;  %v1384_v24 = vadd.f32 %v2414_v14, %v2412_v9 }
 0x230   : > { %v1346_v4 = vmul.f32 1.442695, %v1286_v0  ;;  %v1348_v23 = vmul.f32 1.442695, %v1287_v40  ;;  %v2418_v6 = vpop.eup %2417  ;;  %2437 = vpow2.f32 %v1316_v39  ;;  %v1216_v11 = vpop.permute.xlu1 %1215  ;;  %v821_v0 = vld [vmem:[#allocation5 + $0x30] sm:$0xff] }
 0x231   : > { %v2420_v32 = vpop.eup %2419  ;;  %1385 = vadd.xlane.f32.xlu0 %v1384_v24  ;;  %v1272_v58 = vsub.f32 %v3320_v31, %v1216_v11  ;;  %v1273_v10 = vsub.f32 -1e+30, %v1216_v11  ;;  %v1387_v13 = vadd.f32 %v2418_v6, %v2416_v57  ;;  %v825_v57 = vld [vmem:[#allocation5 + $0x50] sm:$0xff]  ;;  %v822_v6 = vld [vmem:[#allocation5 + $0x38] sm:$0xff] }
 0x232   : > { %2439 = vpow2.f32 %v1346_v4  ;;  %v2422_v48 = vpop.eup %2421  ;;  %v829_v24 = vld [vmem:[#allocation5 + $0x70] sm:$0xff] }
 0x233   : > { %2441 = vpow2.f32 %v1348_v23  ;;  %v2424_v61 = vpop.eup %2423  ;;  %v1318_v55 = vmul.f32 1.442695, %v1272_v58  ;;  %v1320_v34 = vmul.f32 1.442695, %v1273_v10  ;;  %1388 = vadd.xlane.f32.xlu1 %v1387_v13  ;;  %v1366_v52 = vadd.f32 %v2422_v48, %v2420_v32  ;;  %v687_v13 = vld [vmem:[#allocation4 + $0x8] sm:$0xff] }
 0x234   : > { %v2426_v36 = vpop.eup %2425  ;;  %v1256_v62 = vpop.permute.xlu1 %1255  ;;  %v824_v48 = vld [vmem:[#allocation5 + $0x48] sm:$0xff] }
 0x235   : > { %v2428_v33 = vpop.eup %2427  ;;  %2443 = vpow2.f32 %v1318_v55  ;;  %1367 = vadd.xlane.f32.xlu0 %v1366_v52  ;;  %v1288_v50 = vsub.f32 %v3326_v37, %v1256_v62  ;;  %v1289_v44 = vsub.f32 -1e+30, %v1256_v62  ;;  %v1369_v21 = vadd.f32 %v2426_v36, %v2424_v61  ;;  %v689_v36 = vld [vmem:[#allocation4 + $0x18] sm:$0xff] }
 0x236   : > { %v2430_v45 = vpop.eup %2429  ;;  %2445 = vpow2.f32 %v1320_v34  ;;  %v826_v62 = vld [vmem:[#allocation5 + $0x58] sm:$0xff] }
 0x237   : > { %v2432_v31 = vpop.eup %2431  ;;  %v1350_v42 = vmul.f32 1.442695, %v1288_v50  ;;  %v1352_v27 = vmul.f32 1.442695, %v1289_v44  ;;  %1370 = vadd.xlane.f32.xlu1 %v1369_v21  ;;  %v1390_v19 = vadd.f32 %v2430_v45, %v2428_v33  ;;  %v691_v45 = vld [vmem:[#allocation4 + $0x28] sm:$0xff] }
 0x238   : > { %v2434_v1 = vpop.eup %2433 }
 0x239   : > { %v2436_v2 = vpop.eup %2435  ;;  %2447 = vpow2.f32 %v1350_v42  ;;  %1391 = vadd.xlane.f32.xlu0 %v1390_v19  ;;  %v1393_v5 = vadd.f32 %v2434_v1, %v2432_v31  ;;  %v828_v31 = vld [vmem:[#allocation5 + $0x68] sm:$0xff] }
 0x23a   : > { %v2438_v54 = vpop.eup %2437  ;;  %2449 = vpow2.f32 %v1352_v27 }
 0x23b   : > { %1394 = vadd.xlane.f32.xlu1 %v1393_v5  ;;  %v1372_v22 = vadd.f32 %v2438_v54, %v2436_v2  ;;  %v693_v2 = vld [vmem:[#allocation4 + $0x38] sm:$0xff] }
 0x23c   : > { %v2440_v25 = vpop.eup %2439  ;;  %v830_v5 = vld [vmem:[#allocation5 + $0x78] sm:$0xff] }
 0x23d   : > { %v2442_v37 = vpop.eup %2441  ;;  %1373 = vadd.xlane.f32.xlu0 %v1372_v22 }
 0x23e   : > { %v1396_v18 = vadd.f32 %v2442_v37, %v2440_v25 }
 0x23f   : > { %v2444_v7 = vpop.eup %2443 }
 0x240   : > { %v2446_v17 = vpop.eup %2445 }
 0x241   : > { %1397 = vadd.xlane.f32.xlu0 %v1396_v18  ;;  %v1375_v60 = vadd.f32 %v2446_v17, %v2444_v7  ;;  %v688_v18 = vld [vmem:[#allocation4 + $0x10] sm:$0xff] }
 0x243   : > { %v2448_v39 = vpop.eup %2447  ;;  %1376 = vadd.xlane.f32.xlu1 %v1375_v60  ;;  %v690_v60 = vld [vmem:[#allocation4 + $0x20] sm:$0xff] }
 0x244   : > { %v2450_v43 = vpop.eup %2449 }
 0x245   : > { %762 = vadd.xlane.f32.xlu0 %v2996_v35  ;;  %v1399_v9 = vadd.f32 %v2450_v43, %v2448_v39  ;;  %v823_v35 = vld [vmem:[#allocation5 + $0x40] sm:$0xff] }
 0x247   : > { %1400 = vadd.xlane.f32.xlu1 %v1399_v9  ;;  %v692_v9 = vld [vmem:[#allocation4 + $0x30] sm:$0xff] }
 0x249   : > { %768 = vadd.xlane.f32.xlu0 %v3103_v26 }
 0x24b   : > { %759 = vadd.xlane.f32.xlu1 %v2974_v28 }
 0x24d   : > { %774 = vadd.xlane.f32.xlu0 %v3213_v29 }
 0x24f   : > { %765 = vadd.xlane.f32.xlu1 %v3076_v15  ;;  %v827_v15 = vld [vmem:[#allocation5 + $0x60] sm:$0xff] }
 0x251   : > { %780 = vadd.xlane.f32.xlu0 %v3492_v63  ;;  %v820_v63 = vld [vmem:[#allocation5 + $0x28] sm:$0xff] }
 0x253   : > { %771 = vadd.xlane.f32.xlu1 %v3192_v12 }
 0x257   : > { %777 = vadd.xlane.f32.xlu1 %v3296_v3 }
 0x259   : > { %v883_v40 = vpop.xlane.xlu0 %882 }
 0x25a   : > { %v917_v47 = vadd.f32 %v883_v40, %v821_v0 }
 0x25c   : > { %933 = vst.msk [vmem:[#allocation5 + $0x30] sm:$0xff] %vm3987_vm14, %v917_v47  ;;  %vm4002_vm14 = vmmov %vm3940_vm0  ;;  %v4004_v47 = vsub.f32 %v3336_v51, %v3342_v30 }
 0x25d   : > { %v889_v14 = vpop.xlane.xlu0 %888 }
 0x25e   : > { %v919_v26 = vadd.f32 %v889_v14, %v823_v35  ;;  %v1418_v35 = vmul.f32 1.442695, %v4004_v47  ;;  %v4005_v14 = vsub.f32 %v3334_v49, %v3339_v41  ;;  %v4012_v41 = vld [vmem:[#allocation12_spill] sm:$0xff]  ;;  %v3688_v47 = vld [vmem:[#allocation5] sm:$0xff] }
 0x260   : > { %935 = vst.msk [vmem:[#allocation5 + $0x40] sm:$0xff] %vm3988_vm11, %v919_v26  ;;  %vm4003_vm11 = vmmov %vm3940_vm0  ;;  %v1434_v26 = vmul.f32 1.442695, %v4005_v14  ;;  %2451 = vpow2.f32 %v1418_v35  ;;  %v4032_v14 = vld [vmem:[#allocation20_spill] sm:$0xff] }
 0x261   : > { %v895_v28 = vpop.xlane.xlu0 %894 }
 0x262   : > { %v921_v29 = vadd.f32 %v895_v28, %v825_v57  ;;  %2453 = vpow2.f32 %v1434_v26  ;;  %v4006_v57 = vsub.f32 %v3344_v56, %v3357_v8  ;;  %v4015_v56 = vld [vmem:[#allocation7_spill] sm:$0xff]  ;;  %v4016_v8 = vld [vmem:[#allocation9_spill] sm:$0xff] }
 0x263   : > { %v4033_v26 = vld [vmem:[#allocation21_spill] sm:$0xff] }
 0x264   : > { %937 = vst.msk [vmem:[#allocation5 + $0x50] sm:$0xff] %vm3989_vm1, %v921_v29  ;;  %v1420_v28 = vmul.f32 1.442695, %v4006_v57  ;;  %v4007_v29 = vld [vmem:[#allocation8_spill] sm:$0xff]  ;;  %vm4024_vm1 = vmmov %vm3940_vm0  ;;  %v4034_v57 = vsub.f32 %v4032_v14, %v4033_v26 }
 0x265   : > { %v901_v12 = vpop.xlane.xlu0 %900 }
 0x266   : > { %v923_v4 = vadd.f32 %v901_v12, %v827_v15  ;;  %v880_v3 = vpop.xlane.xlu1 %879  ;;  %v4008_v15 = vsub.f32 %v3359_v16, %v4007_v29  ;;  %2455 = vpow2.f32 %v1420_v28  ;;  %v4009_v12 = vld [vmem:[#allocation10_spill] sm:$0xff]  ;;  %v1430_v28 = vmul.f32 1.442695, %v4034_v57 }
 0x267   : > { %v916_v23 = vadd.f32 %v880_v3, %v820_v63  ;;  %v1453_v29 = vld [vmem:[#allocation3 + $0x18] sm:$0xff] }
 0x268   : > { %939 = vst.msk [vmem:[#allocation5 + $0x60] sm:$0xff] %vm3940_vm0, %v923_v4  ;;  %v1436_v63 = vmul.f32 1.442695, %v4008_v15  ;;  %v4010_v4 = vld [vmem:[#allocation11_spill] sm:$0xff] }
 0x269   : > { %932 = vst.msk [vmem:[#allocation5 + $0x28] sm:$0xff] %vm3990_vm6, %v916_v23  ;;  %v907_v11 = vpop.xlane.xlu0 %906  ;;  %v4011_v51 = vsub.f32 %v4009_v12, %v4010_v4  ;;  %v1450_v23 = vld [vmem:[#allocation3] sm:$0xff]  ;;  %vm4031_vm6 = vmmov %vm3940_vm0  ;;  %v2112_v12 = vmax.f32 %v3688_v47, 1.0 }
 0x26a   : > { %v925_v32 = vadd.f32 %v907_v11, %v829_v24  ;;  %v886_v58 = vpop.xlane.xlu1 %885  ;;  %2457 = vpow2.f32 %v1436_v63  ;;  %v2452_v3 = vpop.eup %2451  ;;  %v4013_v24 = vld [vmem:[#allocation14_spill] sm:$0xff] }
 0x26b   : > { %v918_v10 = vadd.f32 %v886_v58, %v822_v6  ;;  %v1422_v30 = vmul.f32 1.442695, %v4011_v51  ;;  %v4014_v6 = vsub.f32 %v4012_v41, %v4013_v24  ;;  %v4017_v58 = vsub.f32 %v4015_v56, %v4016_v8  ;;  %v1460_v51 = vld [vmem:[#allocation3 + $0x50] sm:$0xff]  ;;  %v4037_v41 = vld [vmem:[#allocation24_spill] sm:$0xff]  ;;  %v1461_v56 = vld [vmem:[#allocation3 + $0x58] sm:$0xff] }
 0x26c   : > { %941 = vst.msk [vmem:[#allocation5 + $0x70] sm:$0xff] %vm3991_vm4, %v925_v32  ;;  %v2454_v49 = vpop.eup %2453  ;;  %v1458_v32 = vld [vmem:[#allocation3 + $0x40] sm:$0xff]  ;;  %vm4035_vm4 = vmmov %vm3940_vm0 }
 0x26d   : > { %934 = vst.msk [vmem:[#allocation5 + $0x38] sm:$0xff] %vm3992_vm2, %v918_v10  ;;  %v739_v61 = vpop.xlane.xlu0 %738  ;;  %v1424_v11 = vmul.f32 1.442695, %v4014_v6  ;;  %2459 = vpow2.f32 %v1422_v30  ;;  %v1438_v16 = vmul.f32 1.442695, %v4017_v58  ;;  %v1466_v10 = vmul.f32 %v2452_v3, %v1450_v23  ;;  %v3695_v23 = vld [vmem:[#allocation5 + $0x8] sm:$0xff]  ;;  %vm4039_vm2 = vmmov %vm3940_vm0 }
 0x26e   : > { %v783_v55 = vadd.f32 %v739_v61, %v687_v13  ;;  %v892_v34 = vpop.xlane.xlu1 %891 }
 0x26f   : > { %v920_v52 = vadd.f32 %v892_v34, %v824_v48  ;;  %v1474_v48 = vmul.f32 %v2454_v49, %v1458_v32  ;;  %2461 = vpow2.f32 %v1424_v11  ;;  %v4019_v34 = vld [vmem:[#allocation18_spill] sm:$0xff] }
 0x270   : > { %800 = vst.msk [vmem:[#allocation4 + $0x8] sm:$0xff] %vm3993_vm8, %v783_v55  ;;  %v2456_v61 = vpop.eup %2455  ;;  %v4018_v55 = vld [vmem:[#allocation16_spill] sm:$0xff]  ;;  %2463 = vpow2.f32 %v1438_v16  ;;  %v4036_v49 = vld [vmem:[#allocation22_spill] sm:$0xff]  ;;  %vm4041_vm8 = vmmov %vm3940_vm0 }
 0x271   : > { %936 = vst.msk [vmem:[#allocation5 + $0x48] sm:$0xff] %vm3994_vm7, %v920_v52  ;;  %v745_v33 = vpop.xlane.xlu0 %744  ;;  %v4020_v52 = vsub.f32 %v4018_v55, %v4019_v34  ;;  %v4038_v24 = vsub.f32 %v4036_v49, %v4037_v41  ;;  %v2113_v55 = vmax.f32 %v3695_v23, 1.0  ;;  %v1984_v34 = vld [vmem:[#allocation2] sm:$0xff]  ;;  %vm4045_vm7 = vmmov %vm3940_vm0 }
 0x272   : > { %v785_v50 = vadd.f32 %v745_v33, %v689_v36  ;;  %v898_v44 = vpop.xlane.xlu1 %897 }
 0x273   : > { %v922_v21 = vadd.f32 %v898_v44, %v826_v62  ;;  %v1440_v36 = vmul.f32 1.442695, %v4020_v52  ;;  %v1446_v6 = vmul.f32 1.442695, %v4038_v24 }
 0x274   : > { %802 = vst.msk [vmem:[#allocation4 + $0x18] sm:$0xff] %vm3995_vm10, %v785_v50  ;;  %v1451_v50 = vld [vmem:[#allocation3 + $0x8] sm:$0xff]  ;;  %vm4046_vm10 = vmmov %vm3940_vm0 }
 0x275   : > { %938 = vst.msk [vmem:[#allocation5 + $0x58] sm:$0xff] %vm3996_vm12, %v922_v21  ;;  %v751_v42 = vpop.xlane.xlu0 %750  ;;  %v4021_v21 = vld [vmem:[#allocation13_spill] sm:$0xff]  ;;  %2465 = vpow2.f32 %v1440_v36  ;;  %vm4047_vm12 = vmmov %vm3940_vm0 }
 0x276   : > { %v787_v27 = vadd.f32 %v751_v42, %v691_v45  ;;  %v904_v19 = vpop.xlane.xlu1 %903  ;;  %v4022_v45 = vld [vmem:[#allocation15_spill] sm:$0xff] }
 0x277   : > { %v924_v1 = vadd.f32 %v904_v19, %v828_v31  ;;  %v4023_v31 = vsub.f32 %v4021_v21, %v4022_v45  ;;  %v1467_v19 = vmul.f32 %v2456_v61, %v1451_v50  ;;  %v1454_v61 = vld [vmem:[#allocation3 + $0x20] sm:$0xff]  ;;  %v1455_v50 = vld [vmem:[#allocation3 + $0x28] sm:$0xff]  ;;  %v3706_v21 = vld [vmem:[#allocation5 + $0x18] sm:$0xff] }
 0x278   : > { %804 = vst.msk [vmem:[#allocation4 + $0x28] sm:$0xff] %vm3997_vm15, %v787_v27  ;;  %v2458_v27 = vpop.eup %2457  ;;  %v3708_v45 = vld [vmem:[#allocation5 + $0x10] sm:$0xff]  ;;  %vm4048_vm15 = vmmov %vm3940_vm0 }
 0x279   : > { %940 = vst.msk [vmem:[#allocation5 + $0x68] sm:$0xff] %vm3998_vm3, %v924_v1  ;;  %v757_v54 = vpop.xlane.xlu0 %756  ;;  %v1426_v42 = vmul.f32 1.442695, %v4023_v31  ;;  %v1459_v1 = vld [vmem:[#allocation3 + $0x48] sm:$0xff]  ;;  %v4043_v31 = vld [vmem:[#allocation26_spill] sm:$0xff]  ;;  %vm4049_vm3 = vmmov %vm3940_vm0 }
 0x27a   : > { %v789_v25 = vadd.f32 %v757_v54, %v693_v2  ;;  %v910_v22 = vpop.xlane.xlu1 %909  ;;  %v4025_v2 = vld [vmem:[#allocation19_spill] sm:$0xff] }
 0x27b   : > { %v926_v37 = vadd.f32 %v910_v22, %v830_v5  ;;  %v4026_v5 = vsub.f32 %v4025_v2, %v3439_v38  ;;  %v4027_v22 = vld [vmem:[#allocation17_spill] sm:$0xff]  ;;  %2467 = vpow2.f32 %v1426_v42 }
 0x27c   : > { %806 = vst.msk [vmem:[#allocation4 + $0x38] sm:$0xff] %vm3999_vm13, %v789_v25  ;;  %vm4050_vm13 = vmmov %vm3940_vm0 }
 0x27d   : > { %942 = vst.msk [vmem:[#allocation5 + $0x78] sm:$0xff] %vm4000_vm9, %v926_v37  ;;  %v1428_v54 = vmul.f32 1.442695, %v4026_v5  ;;  %v4028_v37 = vsub.f32 %v4027_v22, %v3422_v59  ;;  %v2000_v5 = vmul.f32 %v1984_v34, %v3688_v47  ;;  %v1986_v34 = vld [vmem:[#allocation2 + $0x10] sm:$0xff]  ;;  %vm4051_vm9 = vmmov %vm3940_vm0 }
 0x27e   : > { %v742_v7 = vpop.xlane.xlu1 %741 }
 0x27f   : > { %v784_v17 = vadd.f32 %v742_v7, %v688_v18  ;;  %v1442_v18 = vmul.f32 1.442695, %v4028_v37  ;;  %2469 = vpow2.f32 %v1428_v54  ;;  %v3715_v37 = vld [vmem:[#allocation5 + $0x20] sm:$0xff] }
 0x281   : > { %801 = vst.msk [vmem:[#allocation4 + $0x10] sm:$0xff] %vm4001_vm5, %v784_v17  ;;  %v1475_v17 = vmul.f32 %v2458_v27, %v1459_v1  ;;  %2471 = vpow2.f32 %v1442_v18  ;;  %vm4052_vm5 = vmmov %vm3940_vm0 }
 0x282   : > { %v748_v39 = vpop.xlane.xlu1 %747 }
 0x283   : > { %v786_v43 = vadd.f32 %v748_v39, %v690_v60  ;;  %v2460_v60 = vpop.eup %2459  ;;  %v4029_v39 = vld [vmem:[#allocation23_spill] sm:$0xff] }
 0x284   : > { %v2462_v59 = vpop.eup %2461 }
 0x285   : > { %803 = vst.msk [vmem:[#allocation4 + $0x20] sm:$0xff] %vm4002_vm14, %v786_v43  ;;  %v4030_v43 = vsub.f32 %v3444_v20, %v4029_v39  ;;  %v2464_v63 = vpop.eup %2463  ;;  %v1469_v30 = vmul.f32 %v2462_v59, %v1453_v29  ;;  %v1463_v39 = vld [vmem:[#allocation3 + $0x68] sm:$0xff]  ;;  %vm4053_vm14 = vmmov %vm3940_vm0 }
 0x286   : > { %v754_v0 = vpop.xlane.xlu1 %753  ;;  %v2466_v3 = vpop.eup %2465  ;;  %v1476_v58 = vmul.f32 %v2464_v63, %v1460_v51  ;;  %v1456_v63 = vld [vmem:[#allocation3 + $0x30] sm:$0xff]  ;;  %v3726_v51 = vld [vmem:[#allocation5 + $0x40] sm:$0xff] }
 0x287   : > { %v788_v40 = vadd.f32 %v754_v0, %v692_v9  ;;  %v1444_v9 = vmul.f32 1.442695, %v4030_v43  ;;  %v2468_v16 = vpop.eup %2467  ;;  %v1477_v36 = vmul.f32 %v2466_v3, %v1461_v56  ;;  %v2115_v43 = vmax.f32 %v3706_v21, 1.0 }
 0x288   : > { %v1470_v1 = vmul.f32 %v2468_v16, %v1454_v61  ;;  %v2120_v16 = vmax.f32 %v3726_v51, 1.0 }
 0x289   : > { %805 = vst.msk [vmem:[#allocation4 + $0x30] sm:$0xff] %vm4003_vm11, %v788_v40  ;;  %v1452_v40 = vld [vmem:[#allocation3 + $0x10] sm:$0xff]  ;;  %vm4054_vm11 = vmmov %vm3940_vm0 }
 0x28a   : > { %v1468_v20 = vmul.f32 %v2460_v60, %v1452_v40  ;;  %v3720_v40 = vld [vmem:[#allocation5 + $0x30] sm:$0xff] }
 0x2ac   : > { %v1356_v13 = vpop.xlane.xlu1 %1355 }
 0x2ad   : > { %v1482_v62 = vadd.f32 %v1466_v10, %v1356_v13  ;;  %v4040_v10 = vsub.f32 %v3480_v53, %v3495_v46  ;;  %v1968_v53 = vld [vmem:[#allocation4] sm:$0xff]  ;;  %v4042_v46 = vld [vmem:[#allocation25_spill] sm:$0xff] }
 0x2ae   : > { %v1380_v33 = vpop.xlane.xlu0 %1379  ;;  %v4044_v42 = vsub.f32 %v4042_v46, %v4043_v31 }
 0x2af   : > { %v1490_v44 = vadd.f32 %v1474_v48, %v1380_v33  ;;  %1498 = vst.msk [vmem:[#allocation3] sm:$0xff] %vm4024_vm1, %v1482_v62  ;;  %v1432_v13 = vmul.f32 1.442695, %v4040_v10  ;;  %v2470_v62 = vpop.eup %2469  ;;  %v3739_v10 = vld [vmem:[#allocation5 + $0x28] sm:$0xff]  ;;  %vm4055_vm1 = vmmov %vm3940_vm0 }
 0x2b0   : > { %v1448_v27 = vmul.f32 1.442695, %v4044_v42  ;;  %v1471_v60 = vmul.f32 %v2470_v62, %v1455_v50  ;;  %v1457_v50 = vld [vmem:[#allocation3 + $0x38] sm:$0xff]  ;;  %v2117_v46 = vmax.f32 %v3739_v10, 1.0 }
 0x2b1   : > { %1506 = vst.msk [vmem:[#allocation3 + $0x40] sm:$0xff] %vm3940_vm0, %v1490_v44  ;;  %v2472_v44 = vpop.eup %2471 }
 0x2b2   : > { %v1359_v25 = vpop.xlane.xlu0 %1358 }
 0x2b3   : > { %v1483_v7 = vadd.f32 %v1467_v19, %v1359_v25  ;;  %v1462_v25 = vld [vmem:[#allocation3 + $0x60] sm:$0xff] }
 0x2b4   : > { %v1383_v0 = vpop.xlane.xlu1 %1382  ;;  %v1478_v26 = vmul.f32 %v2472_v44, %v1462_v25  ;;  %v3748_v25 = vld [vmem:[#allocation5 + $0x48] sm:$0xff] }
 0x2b5   : > { %1499 = vst.msk [vmem:[#allocation3 + $0x8] sm:$0xff] %vm4031_vm6, %v1483_v7  ;;  %v1491_v38 = vadd.f32 %v1475_v17, %v1383_v0  ;;  %v2016_v0 = vsub.f32 %v1968_v53, %v2000_v5  ;;  %v1987_v53 = vld [vmem:[#allocation2 + $0x18] sm:$0xff]  ;;  %vm4056_vm6 = vmmov %vm3940_vm0 }
 0x2b6   : > { %v2032_v35 = vld [vmem:[#allocation3] sm:$0xff] }
 0x2b7   : > { %2473 = vlog2.f32 %v2032_v35  ;;  %1507 = vst.msk [vmem:[#allocation3 + $0x48] sm:$0xff] %vm4035_vm4, %v1491_v38  ;;  %v1985_v35 = vld [vmem:[#allocation2 + $0x8] sm:$0xff]  ;;  %vm4057_vm4 = vmmov %vm3940_vm0 }
 0x2b8   : > { %2475 = vpow2.f32 %v1444_v9  ;;  %v1362_v15 = vpop.xlane.xlu0 %1361  ;;  %v2114_v9 = vmax.f32 %v3708_v45, 1.0  ;;  %v2001_v41 = vmul.f32 %v1985_v35, %v3695_v23  ;;  %v3755_v35 = vld [vmem:[#allocation5 + $0x38] sm:$0xff] }
 0x2b9   : > { %v1484_v4 = vadd.f32 %v1468_v20, %v1362_v15  ;;  %2477 = vpow2.f32 %v1430_v28  ;;  %v2116_v28 = vmax.f32 %v3715_v37, 1.0 }
 0x2bb   : > { %1500 = vst.msk [vmem:[#allocation3 + $0x10] sm:$0xff] %vm4039_vm2, %v1484_v4  ;;  %v2118_v4 = vmax.f32 %v3720_v40, 1.0  ;;  %vm4058_vm2 = vmmov %vm3940_vm0 }
 0x2bc   : > { %v2033_v11 = vld [vmem:[#allocation3 + $0x8] sm:$0xff]  ;;  %v1365_v32 = vpop.xlane.xlu1 %1364 }
 0x2bd   : > { %2479 = vlog2.f32 %v2033_v11  ;;  %v1485_v8 = vadd.f32 %v1469_v30, %v1365_v32  ;;  %v1969_v30 = vld [vmem:[#allocation4 + $0x8] sm:$0xff] }
 0x2be   : > { %2481 = vrcp.f32 %v2112_v12  ;;  %v1386_v48 = vpop.xlane.xlu0 %1385  ;;  %v2041_v32 = vld [vmem:[#allocation3 + $0x48] sm:$0xff] }
 0x2bf   : > { %1501 = vst.msk [vmem:[#allocation3 + $0x18] sm:$0xff] %vm4041_vm8, %v1485_v8  ;;  %v1492_v52 = vadd.f32 %v1476_v58, %v1386_v48  ;;  %2483 = vpow2.f32 %v1446_v6  ;;  %vm4059_vm8 = vmmov %vm3940_vm0 }
 0x2c0   : > { %v1389_v33 = vpop.xlane.xlu1 %1388  ;;  %2485 = vpow2.f32 %v1432_v13  ;;  %v2017_v13 = vsub.f32 %v1969_v30, %v2001_v41 }
 0x2c1   : > { %1508 = vst.msk [vmem:[#allocation3 + $0x50] sm:$0xff] %vm4045_vm7, %v1492_v52  ;;  %v1493_v19 = vadd.f32 %v1477_v36, %v1389_v33  ;;  %v2474_v2 = vpop.eup %2473  ;;  %2487 = vrcp.f32 %v2113_v55  ;;  %v1464_v55 = vld [vmem:[#allocation3 + $0x70] sm:$0xff]  ;;  %vm4060_vm7 = vmmov %vm3940_vm0 }
 0x2c2   : > { %v1368_v54 = vpop.xlane.xlu0 %1367  ;;  %v2476_v22 = vpop.eup %2475  ;;  %v2049_v18 = vmul.f32 0.6931472, %v2474_v2  ;;  %v2034_v7 = vld [vmem:[#allocation3 + $0x10] sm:$0xff] }
 0x2c3   : > { %1509 = vst.msk [vmem:[#allocation3 + $0x58] sm:$0xff] %vm4046_vm10, %v1493_v19  ;;  %v1486_v17 = vadd.f32 %v1470_v1, %v1368_v54  ;;  %2489 = vlog2.f32 %v2034_v7  ;;  %v2478_v57 = vpop.eup %2477  ;;  %v1479_v15 = vmul.f32 %v2476_v22, %v1463_v39  ;;  %v1970_v19 = vld [vmem:[#allocation4 + $0x10] sm:$0xff]  ;;  %v2040_v22 = vld [vmem:[#allocation3 + $0x40] sm:$0xff]  ;;  %v2003_v39 = vmul.f32 %v1987_v53, %v3706_v21  ;;  %vm4061_vm10 = vmmov %vm3940_vm0 }
 0x2c4   : > { %v1371_v38 = vpop.xlane.xlu1 %1370  ;;  %2491 = vpow2.f32 %v1448_v27  ;;  %v2080_v59 = vmul.f32 %v2049_v18, %v3688_v47  ;;  %v1472_v8 = vmul.f32 %v2478_v57, %v1456_v63  ;;  %v2002_v27 = vmul.f32 %v1986_v34, %v3708_v45  ;;  %v694_v53 = vld [vmem:[#allocation4 + $0x40] sm:$0xff] }
 0x2c5   : > { %1502 = vst.msk [vmem:[#allocation3 + $0x20] sm:$0xff] %vm4047_vm12, %v1486_v17  ;;  %v1487_v14 = vadd.f32 %v1471_v60, %v1371_v38  ;;  %v1465_v60 = vld [vmem:[#allocation3 + $0x78] sm:$0xff]  ;;  %vm4062_vm12 = vmmov %vm3940_vm0 }
 0x2c6   : > { %v2035_v20 = vld [vmem:[#allocation3 + $0x18] sm:$0xff]  ;;  %v1392_v29 = vpop.xlane.xlu0 %1391  ;;  %v2096_v3 = vsub.f32 %v2016_v0, %v2080_v59  ;;  %v695_v0 = vld [vmem:[#allocation4 + $0x48] sm:$0xff] }
 0x2c7   : > { %v2480_v12 = vpop.eup %2479  ;;  %2493 = vlog2.f32 %v2035_v20  ;;  %1503 = vst.msk [vmem:[#allocation3 + $0x28] sm:$0xff] %vm4048_vm15, %v1487_v14  ;;  %v1494_v47 = vadd.f32 %v1478_v26, %v1392_v29  ;;  %v1971_v59 = vld [vmem:[#allocation4 + $0x18] sm:$0xff]  ;;  %v2018_v14 = vsub.f32 %v1970_v19, %v2002_v27  ;;  %v2121_v29 = vmax.f32 %v3748_v25, 1.0  ;;  %vm4063_vm15 = vmmov %vm3940_vm0 }
 0x2c8   : > { %v2482_v49 = vpop.eup %2481  ;;  %2495 = vrcp.f32 %v2114_v9  ;;  %v2051_v24 = vmul.f32 0.6931472, %v2480_v12  ;;  %v1395_v6 = vpop.xlane.xlu1 %1394  ;;  %v2042_v57 = vld [vmem:[#allocation3 + $0x50] sm:$0xff] }
 0x2c9   : > { %2497 = vrcp.f32 %v2115_v43  ;;  %v2129_v11 = vmul.f32 %v2482_v49, %v2096_v3  ;;  %1510 = vst.msk [vmem:[#allocation3 + $0x60] sm:$0xff] %vm4049_vm3, %v1494_v47  ;;  %v1495_v56 = vadd.f32 %v1479_v15, %v1395_v6  ;;  %v2484_v58 = vpop.eup %2483  ;;  %v3751_v43 = vld [vmem:[#allocation5 + $0x50] sm:$0xff]  ;;  %v3760_v15 = vld [vmem:[#allocation5 + $0x58] sm:$0xff]  ;;  %v2019_v6 = vsub.f32 %v1971_v59, %v2003_v39  ;;  %vm4064_vm3 = vmmov %vm3940_vm0 }
 0x2ca   : > { %2499 = vrcp.f32 %v2116_v28  ;;  %v2081_v48 = vmul.f32 %v2051_v24, %v3695_v23  ;;  %v1374_v61 = vpop.xlane.xlu0 %1373  ;;  %v2486_v36 = vpop.eup %2485  ;;  %v2043_v31 = vld [vmem:[#allocation3 + $0x58] sm:$0xff]  ;;  %v1480_v23 = vmul.f32 %v2484_v58, %v1464_v55  ;;  %v2122_v47 = vmax.f32 %v3751_v43, 1.0 }
 0x2cb   : > { %2501 = vrcp.f32 %v2118_v4  ;;  %2160 = vst.msk [vmem:[%s3734_s15] sm:$0xff] %vm4050_vm13, %v2129_v11  ;;  %v1488_v52 = vadd.f32 %v1472_v8, %v1374_v61  ;;  %v2488_v44 = vpop.eup %2487  ;;  %v1473_v17 = vmul.f32 %v2486_v36, %v1457_v50  ;;  %v2119_v24 = vmax.f32 %v3755_v35, 1.0  ;;  %v697_v8 = vld [vmem:[#allocation4 + $0x58] sm:$0xff]  ;;  %v3771_v61 = vld [vmem:[#allocation5 + $0x68] sm:$0xff]  ;;  %v1994_v36 = vld [vmem:[#allocation2 + $0x50] sm:$0xff] }
 0x2cc   : > { %1511 = vst.msk [vmem:[#allocation3 + $0x68] sm:$0xff] %vm4051_vm9, %v1495_v56  ;;  %v2097_v62 = vsub.f32 %v2017_v13, %v2081_v48  ;;  %2503 = vlog2.f32 %v2041_v32  ;;  %v2036_v33 = vld [vmem:[#allocation3 + $0x20] sm:$0xff]  ;;  %v1990_v13 = vld [vmem:[#allocation2 + $0x30] sm:$0xff]  ;;  %v2123_v48 = vmax.f32 %v3760_v15, 1.0  ;;  %vm4065_vm13 = vmmov %vm3940_vm0 }
 0x2cd   : > { %2505 = vlog2.f32 %v2036_v33  ;;  %1504 = vst.msk [vmem:[#allocation3 + $0x30] sm:$0xff] %vm4052_vm5, %v1488_v52  ;;  %v2490_v42 = vpop.eup %2489  ;;  %v3776_v33 = vmul.f32 %v1990_v13, %v3720_v40  ;;  %vm4066_vm9 = vmmov %vm3940_vm0 }
 0x2ce   : > { %2507 = vrcp.f32 %v2120_v16  ;;  %v2131_v1 = vmul.f32 %v2488_v44, %v2097_v62  ;;  %v2037_v2 = vld [vmem:[#allocation3 + $0x28] sm:$0xff]  ;;  %v1398_v5 = vpop.xlane.xlu0 %1397  ;;  %v2492_v54 = vpop.eup %2491  ;;  %v2053_v18 = vmul.f32 0.6931472, %v2490_v42  ;;  %v1988_v16 = vld [vmem:[#allocation2 + $0x20] sm:$0xff]  ;;  %vm4067_vm5 = vmmov %vm3940_vm0 }
 0x2cf   : > { %2509 = vlog2.f32 %v2037_v2  ;;  %v1496_v7 = vadd.f32 %v1480_v23, %v1398_v5  ;;  %v1481_v30 = vmul.f32 %v2492_v54, %v1465_v60  ;;  %v2004_v62 = vmul.f32 %v1988_v16, %v3715_v37  ;;  %v1972_v42 = vld [vmem:[#allocation4 + $0x20] sm:$0xff]  ;;  %v1989_v2 = vld [vmem:[#allocation2 + $0x28] sm:$0xff]  ;;  %v3801_v16 = vld [vmem:[#allocation5 + $0x78] sm:$0xff] }
 0x2d0   : > { %2161 = vst.msk [vmem:[%s3734_s15 + $0x8] sm:$0xff] %vm4053_vm14, %v2131_v1  ;;  %2511 = vlog2.f32 %v2043_v31  ;;  %v1377_v9 = vpop.xlane.xlu1 %1376  ;;  %v2082_v26 = vmul.f32 %v2053_v18, %v3708_v45  ;;  %v3782_v23 = vmul.f32 %v1994_v36, %v3751_v43  ;;  %v2044_v27 = vld [vmem:[#allocation3 + $0x60] sm:$0xff]  ;;  %v2125_v54 = vmax.f32 %v3771_v61, 1.0  ;;  %vm4068_vm14 = vmmov %vm3940_vm0 }
 0x2d1   : > { %v2494_v38 = vpop.eup %2493  ;;  %2513 = vrcp.f32 %v2117_v46  ;;  %1512 = vst.msk [vmem:[#allocation3 + $0x70] sm:$0xff] %vm4054_vm11, %v1496_v7  ;;  %v1489_v28 = vadd.f32 %v1473_v17, %v1377_v9  ;;  %v3789_v5 = vld [vmem:[#allocation5 + $0x60] sm:$0xff]  ;;  %v699_v17 = vld [vmem:[#allocation4 + $0x68] sm:$0xff]  ;;  %v2005_v39 = vmul.f32 %v1989_v2, %v3739_v10  ;;  %v2127_v2 = vmax.f32 %v3801_v16, 1.0  ;;  %vm4069_vm11 = vmmov %vm3940_vm0 }
 0x2d2   : > { %v2496_v20 = vpop.eup %2495  ;;  %2515 = vlog2.f32 %v2040_v22  ;;  %v2055_v63 = vmul.f32 0.6931472, %v2494_v38  ;;  %v763_v4 = vpop.xlane.xlu0 %762  ;;  %v2098_v49 = vsub.f32 %v2018_v14, %v2082_v26  ;;  %v1973_v9 = vld [vmem:[#allocation4 + $0x28] sm:$0xff]  ;;  %v2020_v26 = vsub.f32 %v1972_v42, %v2004_v62 }
 0x2d3   : > { %v2045_v12 = vld [vmem:[#allocation3 + $0x68] sm:$0xff]  ;;  %v2498_v3 = vpop.eup %2497  ;;  %1505 = vst.msk [vmem:[#allocation3 + $0x38] sm:$0xff] %vm4055_vm1, %v1489_v28  ;;  %v791_v45 = vadd.f32 %v763_v4, %v695_v0  ;;  %v2124_v4 = vmax.f32 %v3789_v5, 1.0  ;;  %vm4070_vm1 = vmmov %vm3940_vm0 }
 0x2d4   : > { %2517 = vlog2.f32 %v2045_v12  ;;  %v3764_v41 = vpop.eup %2499  ;;  %v2083_v11 = vmul.f32 %v2055_v63, %v3706_v21  ;;  %v2038_v32 = vld [vmem:[#allocation3 + $0x30] sm:$0xff]  ;;  %v1401_v56 = vpop.xlane.xlu1 %1400  ;;  %v2133_v55 = vmul.f32 %v2496_v20, %v2098_v49  ;;  %v1992_v21 = vld [vmem:[#allocation2 + $0x40] sm:$0xff]  ;;  %v1993_v14 = vld [vmem:[#allocation2 + $0x48] sm:$0xff] }
 0x2d5   : > { %2519 = vlog2.f32 %v2042_v57  ;;  %v3768_v58 = vpop.eup %2501  ;;  %808 = vst.msk [vmem:[#allocation4 + $0x48] sm:$0xff] %vm3940_vm0, %v791_v45  ;;  %v1497_v34 = vadd.f32 %v1481_v30, %v1401_v56  ;;  %v3779_v31 = vmul.f32 %v1992_v21, %v3726_v51  ;;  %v696_v63 = vld [vmem:[#allocation4 + $0x50] sm:$0xff]  ;;  %v2009_v30 = vmul.f32 %v1993_v14, %v3748_v25  ;;  %v1997_v14 = vld [vmem:[#allocation2 + $0x68] sm:$0xff] }
 0x2d6   : > { %2521 = vlog2.f32 %v2038_v32  ;;  %v2504_v52 = vpop.eup %2503  ;;  %v2099_v50 = vsub.f32 %v2019_v6, %v2083_v11  ;;  %v769_v44 = vpop.xlane.xlu0 %768  ;;  %2162 = vst.msk [vmem:[%s3734_s15 + $0x10] sm:$0xff] %vm4056_vm6, %v2133_v55  ;;  %v2021_v45 = vsub.f32 %v1973_v9, %v2005_v39  ;;  %v701_v32 = vld [vmem:[#allocation4 + $0x78] sm:$0xff]  ;;  %vm4071_vm6 = vmmov %vm3940_vm0 }
 0x2d7   : > { %2523 = vrcp.f32 %v2121_v29  ;;  %v2506_v46 = vpop.eup %2505  ;;  %1513 = vst.msk [vmem:[#allocation3 + $0x78] sm:$0xff] %vm4057_vm4, %v1497_v34  ;;  %v793_v19 = vadd.f32 %v769_v44, %v697_v8  ;;  %v2067_v0 = vmul.f32 0.6931472, %v2504_v52  ;;  %v1995_v8 = vld [vmem:[#allocation2 + $0x58] sm:$0xff]  ;;  %v698_v44 = vld [vmem:[#allocation4 + $0x60] sm:$0xff]  ;;  %vm4072_vm4 = vmmov %vm3940_vm0 }
 0x2d8   : > { %2525 = vrcp.f32 %v2122_v47  ;;  %v3787_v1 = vpop.eup %2507  ;;  %v2135_v22 = vmul.f32 %v2498_v3, %v2099_v50  ;;  %v2057_v18 = vmul.f32 0.6931472, %v2506_v46  ;;  %v760_v7 = vpop.xlane.xlu1 %759  ;;  %v2046_v3 = vld [vmem:[#allocation3 + $0x70] sm:$0xff]  ;;  %v2011_v21 = vmul.f32 %v1995_v8, %v3760_v15 }
 0x2d9   : > { %2527 = vrcp.f32 %v2119_v24  ;;  %v2510_v60 = vpop.eup %2509  ;;  %810 = vst.msk [vmem:[#allocation4 + $0x58] sm:$0xff] %vm4058_vm2, %v793_v19  ;;  %v790_v38 = vadd.f32 %v760_v7, %v694_v53  ;;  %v1974_v46 = vld [vmem:[#allocation4 + $0x30] sm:$0xff]  ;;  %vm4073_vm2 = vmmov %vm3940_vm0 }
 0x2da   : > { %2529 = vrcp.f32 %v2123_v48  ;;  %v2512_v59 = vpop.eup %2511  ;;  %2163 = vst.msk [vmem:[%s3734_s15 + $0x18] sm:$0xff] %vm4059_vm8, %v2135_v22  ;;  %v2084_v57 = vmul.f32 %v2057_v18, %v3715_v37  ;;  %v2059_v28 = vmul.f32 0.6931472, %v2510_v60  ;;  %v2039_v20 = vld [vmem:[#allocation3 + $0x38] sm:$0xff]  ;;  %v775_v29 = vpop.xlane.xlu0 %774  ;;  %v2089_v48 = vmul.f32 %v2067_v0, %v3748_v25  ;;  %v3813_v60 = vld [vmem:[#allocation5 + $0x70] sm:$0xff]  ;;  %vm4074_vm8 = vmmov %vm3940_vm0 }
 0x2db   : > { %2531 = vlog2.f32 %v2044_v27  ;;  %v2514_v12 = vpop.eup %2513  ;;  %807 = vst.msk [vmem:[#allocation4 + $0x40] sm:$0xff] %vm4060_vm7, %v790_v38  ;;  %v795_v47 = vadd.f32 %v775_v29, %v699_v17  ;;  %v2071_v13 = vmul.f32 0.6931472, %v2512_v59  ;;  %v700_v29 = vld [vmem:[#allocation4 + $0x70] sm:$0xff]  ;;  %vm4075_vm7 = vmmov %vm3940_vm0 }
 0x2dc   : > { %2533 = vlog2.f32 %v2039_v20  ;;  %v2516_v49 = vpop.eup %2515  ;;  %v2100_v24 = vsub.f32 %v2020_v26, %v2084_v57  ;;  %v2085_v37 = vmul.f32 %v2059_v28, %v3739_v10  ;;  %v1977_v6 = vld [vmem:[#allocation4 + $0x48] sm:$0xff]  ;;  %v766_v11 = vpop.xlane.xlu1 %765  ;;  %v2022_v26 = vsub.f32 %v1974_v46, %v3776_v33 }
 0x2dd   : > { %2535 = vrcp.f32 %v2125_v54  ;;  %v2025_v55 = vsub.f32 %v1977_v6, %v2009_v30  ;;  %812 = vst.msk [vmem:[#allocation4 + $0x68] sm:$0xff] %vm4061_vm10, %v795_v47  ;;  %v792_v34 = vadd.f32 %v766_v11, %v696_v63  ;;  %v2065_v42 = vmul.f32 0.6931472, %v2516_v49  ;;  %v1975_v6 = vld [vmem:[#allocation4 + $0x38] sm:$0xff]  ;;  %vm4076_vm10 = vmmov %vm3940_vm0 }
 0x2de   : > { %v2518_v56 = vpop.eup %2517  ;;  %v2137_v10 = vmul.f32 %v3764_v41, %v2100_v24  ;;  %v2101_v36 = vsub.f32 %v2021_v45, %v2085_v37  ;;  %2537 = vlog2.f32 %v2046_v3  ;;  %v2047_v62 = vld [vmem:[#allocation3 + $0x78] sm:$0xff]  ;;  %v781_v50 = vpop.xlane.xlu0 %780  ;;  %v2091_v9 = vmul.f32 %v2071_v13, %v3760_v15 }
 0x2df   : > { %v2520_v52 = vpop.eup %2519  ;;  %v2105_v27 = vsub.f32 %v2025_v55, %v2089_v48  ;;  %2539 = vlog2.f32 %v2047_v62  ;;  %809 = vst.msk [vmem:[#allocation4 + $0x50] sm:$0xff] %vm4062_vm12, %v792_v34  ;;  %v797_v25 = vadd.f32 %v781_v50, %v701_v32  ;;  %v2075_v41 = vmul.f32 0.6931472, %v2518_v56  ;;  %v1991_v37 = vld [vmem:[#allocation2 + $0x38] sm:$0xff]  ;;  %v1996_v62 = vld [vmem:[#allocation2 + $0x60] sm:$0xff] }
 0x2e0   : > { %v2522_v53 = vpop.eup %2521  ;;  %2164 = vst.msk [vmem:[%s3734_s15 + $0x20] sm:$0xff] %vm4063_vm15, %v2137_v10  ;;  %v2139_v54 = vmul.f32 %v2514_v12, %v2101_v36  ;;  %v1979_v18 = vld [vmem:[#allocation4 + $0x58] sm:$0xff]  ;;  %v772_v7 = vpop.xlane.xlu1 %771  ;;  %2541 = vrcp.f32 %v2124_v4  ;;  %v2069_v57 = vmul.f32 0.6931472, %v2520_v52  ;;  %v2013_v15 = vmul.f32 %v1997_v14, %v3771_v61 }
 0x2e1   : > { %v2524_v19 = vpop.eup %2523  ;;  %v2061_v22 = vmul.f32 0.6931472, %v2522_v53  ;;  %v2027_v0 = vsub.f32 %v1979_v18, %v2011_v21  ;;  %814 = vst.msk [vmem:[#allocation4 + $0x78] sm:$0xff] %vm4064_vm3, %v797_v25  ;;  %v794_v38 = vadd.f32 %v772_v7, %v698_v44  ;;  %v2088_v3 = vmul.f32 %v2065_v42, %v3726_v51  ;;  %v1999_v44 = vld [vmem:[#allocation2 + $0x78] sm:$0xff]  ;;  %v1998_v18 = vld [vmem:[#allocation2 + $0x70] sm:$0xff] }
 0x2e2   : > { %v3811_v17 = vpop.eup %2525  ;;  %v2147_v39 = vmul.f32 %v2524_v19, %v2105_v27  ;;  %2165 = vst.msk [vmem:[%s3734_s15 + $0x28] sm:$0xff] %vm4065_vm13, %v2139_v54  ;;  %v1976_v20 = vld [vmem:[#allocation4 + $0x40] sm:$0xff]  ;;  %v2126_v4 = vmax.f32 %v3813_v60, 1.0  ;;  %2543 = vrcp.f32 %v2127_v2  ;;  %v2007_v8 = vmul.f32 %v1991_v37, %v3755_v35 }
 0x2e3   : > { %v3817_v59 = vpop.eup %2527  ;;  %v2086_v28 = vmul.f32 %v2061_v22, %v3720_v40  ;;  %v2107_v12 = vsub.f32 %v2027_v0, %v2091_v9  ;;  %v2024_v30 = vsub.f32 %v1976_v20, %v3779_v31  ;;  %811 = vst.msk [vmem:[#allocation4 + $0x60] sm:$0xff] %vm4067_vm5, %v794_v38  ;;  %v2093_v40 = vmul.f32 %v2075_v41, %v3771_v61 }
 0x2e4   : > { %v2530_v63 = vpop.eup %2529  ;;  %2169 = vst.msk [vmem:[%s3734_s15 + $0x48] sm:$0xff] %vm4066_vm9, %v2147_v39  ;;  %v1981_v49 = vld [vmem:[#allocation4 + $0x68] sm:$0xff]  ;;  %v778_v45 = vpop.xlane.xlu1 %777  ;;  %v2090_v61 = vmul.f32 %v2069_v57, %v3751_v43  ;;  %2545 = vrcp.f32 %v2126_v4  ;;  %v2012_v53 = vmul.f32 %v1996_v62, %v3789_v5  ;;  %v2015_v42 = vmul.f32 %v1999_v44, %v3801_v16 }
 0x2e5   : > { %v2532_v33 = vpop.eup %2531  ;;  %v2102_v47 = vsub.f32 %v2022_v26, %v2086_v28  ;;  %v2151_v11 = vmul.f32 %v2530_v63, %v2107_v12  ;;  %v2104_v32 = vsub.f32 %v2024_v30, %v2088_v3  ;;  %v2029_v31 = vsub.f32 %v1981_v49, %v2013_v15 }
 0x2e6   : > { %v2534_v24 = vpop.eup %2533  ;;  %v796_v56 = vadd.f32 %v778_v45, %v700_v29  ;;  %v1978_v55 = vld [vmem:[#allocation4 + $0x50] sm:$0xff]  ;;  %v2073_v34 = vmul.f32 0.6931472, %v2532_v33  ;;  %v2014_v0 = vmul.f32 %v1998_v18, %v3813_v60 }
 0x2e7   : > { %v2536_v51 = vpop.eup %2535  ;;  %v2141_v13 = vmul.f32 %v3768_v58, %v2102_v47  ;;  %v2063_v48 = vmul.f32 0.6931472, %v2534_v24  ;;  %2171 = vst.msk [vmem:[%s3734_s15 + $0x58] sm:$0xff] %vm4068_vm14, %v2151_v11  ;;  %v2145_v52 = vmul.f32 %v3787_v1, %v2104_v32  ;;  %v2109_v21 = vsub.f32 %v2029_v31, %v2093_v40 }
 0x2e8   : > { %v2026_v10 = vsub.f32 %v1978_v55, %v3782_v23  ;;  %813 = vst.msk [vmem:[#allocation4 + $0x70] sm:$0xff] %vm4069_vm11, %v796_v56  ;;  %v2538_v36 = vpop.eup %2537  ;;  %v2023_v58 = vsub.f32 %v1975_v6, %v2007_v8  ;;  %v1983_v23 = vld [vmem:[#allocation4 + $0x78] sm:$0xff]  ;;  %v2092_v41 = vmul.f32 %v2073_v34, %v3789_v5 }
 0x2e9   : > { %2166 = vst.msk [vmem:[%s3734_s15 + $0x30] sm:$0xff] %vm4070_vm1, %v2141_v13  ;;  %v2087_v43 = vmul.f32 %v2063_v48, %v3755_v35  ;;  %v2540_v50 = vpop.eup %2539  ;;  %v2155_v1 = vmul.f32 %v2536_v51, %v2109_v21  ;;  %v2077_v2 = vmul.f32 0.6931472, %v2538_v36  ;;  %v2031_v9 = vsub.f32 %v1983_v23, %v2015_v42 }
 0x2ea   : > { %2168 = vst.msk [vmem:[%s3734_s15 + $0x40] sm:$0xff] %vm3940_vm0, %v2145_v52  ;;  %v2106_v46 = vsub.f32 %v2026_v10, %v2090_v61  ;;  %v2079_v25 = vmul.f32 0.6931472, %v2540_v50  ;;  %v1980_v19 = vld [vmem:[#allocation4 + $0x60] sm:$0xff]  ;;  %v2542_v22 = vpop.eup %2541 }
 0x2eb   : > { %v2103_v27 = vsub.f32 %v2023_v58, %v2087_v43  ;;  %2173 = vst.msk [vmem:[%s3734_s15 + $0x68] sm:$0xff] %vm4071_vm6, %v2155_v1  ;;  %v2028_v54 = vsub.f32 %v1980_v19, %v2012_v53  ;;  %v2094_v28 = vmul.f32 %v2077_v2, %v3813_v60 }
 0x2ec   : > { %v2149_v35 = vmul.f32 %v3811_v17, %v2106_v46  ;;  %v2095_v39 = vmul.f32 %v2079_v25, %v3801_v16  ;;  %v2544_v14 = vpop.eup %2543 }
 0x2ed   : > { %v2143_v7 = vmul.f32 %v3817_v59, %v2103_v27  ;;  %v2108_v38 = vsub.f32 %v2028_v54, %v2092_v41 }
 0x2ee   : > { %2170 = vst.msk [vmem:[%s3734_s15 + $0x50] sm:$0xff] %vm4072_vm4, %v2149_v35  ;;  %v2111_v17 = vsub.f32 %v2031_v9, %v2095_v39  ;;  %v2546_v20 = vpop.eup %2545 }
 0x2ef   : > { %2167 = vst.msk [vmem:[%s3734_s15 + $0x38] sm:$0xff] %vm4073_vm2, %v2143_v7  ;;  %v1982_v5 = vld [vmem:[#allocation4 + $0x70] sm:$0xff]  ;;  %v2153_v26 = vmul.f32 %v2542_v22, %v2108_v38 }
 0x2f0   : > { %v2030_v57 = vsub.f32 %v1982_v5, %v2014_v0  ;;  %v2159_v59 = vmul.f32 %v2544_v14, %v2111_v17 }
 0x2f1   : > { %2172 = vst.msk [vmem:[%s3734_s15 + $0x60] sm:$0xff] %vm4074_vm8, %v2153_v26 }
 0x2f2   : > { %v2110_v16 = vsub.f32 %v2030_v57, %v2094_v28  ;;  %2175 = vst.msk [vmem:[%s3734_s15 + $0x78] sm:$0xff] %vm4075_vm7, %v2159_v59 }
 0x2f4   : > { %v2157_v29 = vmul.f32 %v2546_v20, %v2110_v16 }
 0x2f6   : > { %2174 = vst.msk [vmem:[%s3734_s15 + $0x70] sm:$0xff] %vm4076_vm10, %v2157_v29 }
 0x2f7 PF: > { %s14_s17 = sadd.s32 1, %s2569_s17   ;;  %s4077_s15 = smov %s2565_s16 }
 0x2f8   : > { %p11_p5 = scmp.ge.s32.totalorder %s14_s17, 4   ;;  %s4078_s16 = smov %s4080_s18 }
 0x2fa   :  { %13 = sbr.rel (!%p11_p5) target bundleno = 2 (0x2), region = 91 }

</bundles_post_ra>
